<compile_context>
chip_gen: v6e
topology: v6e:2x2x1
jax: 0.10.0
libtpu: 0.0.40
codegen_flags: <defaults>
</compile_context>

<pallas_src>
import functools

import jax
import jax.numpy as jnp
from jax import lax
from jax.experimental import pallas as pl
from jax.experimental.pallas import tpu as pltpu


def _round_up(v, m):
    return (v + m - 1) // m * m


def mlp_kernel(x_ref, w1_ref, b1_ref, g_ref, beta_ref, w2_ref, b2_ref, o_ref):
    x = x_ref[...]                                      # (tm, input_dim), compute dtype

    # ---- fc1 on the MXU: low-precision inputs, f32 accumulation ----
    h = jnp.dot(x, w1_ref[...], preferred_element_type=jnp.float32)
    h = h + b1_ref[...]

    # ---- GELU (exact, erf-based, matching torch.nn.functional.gelu default), f32 ----
    h = 0.5 * h * (1.0 + lax.erf(h * 0.7071067811865476))

    # ---- LayerNorm over last dim, eps = 1e-6, affine (gamma, beta), f32 ----
    mean = jnp.mean(h, axis=-1, keepdims=True)
    centered = h - mean
    var = jnp.mean(centered * centered, axis=-1, keepdims=True)
    h = centered * lax.rsqrt(var + 1e-6)
    h = h * g_ref[...] + beta_ref[...]

    # ---- Dropout: identity in eval mode ----
    # TODO(synk): training-mode dropout needs pltpu.prng_seed + prng_random_bits masking.

    # ---- fc2 on the MXU: cast the f32 activations back to the compute dtype ----
    out = jnp.dot(h.astype(w2_ref.dtype), w2_ref[...],
                  preferred_element_type=jnp.float32)
    out = out + b2_ref[...]
    o_ref[...] = out.astype(o_ref.dtype)


@functools.partial(jax.jit, static_argnames=("tm", "compute_dtype", "out_dtype"))
def mlp_forward(x, w1, b1, gamma, beta, w2, b2, *, tm=256,
                compute_dtype=jnp.bfloat16, out_dtype=None):
    n, input_dim = x.shape
    hid_dim = w1.shape[1]
    if out_dtype is None:
        out_dtype = x.dtype

    # Matmul operands in bf16 (MXU-native); biases / LN affine stay f32.
    xc = x.astype(compute_dtype)
    w1c = w1.astype(compute_dtype)
    w2c = w2.astype(compute_dtype)
    b1f = b1.astype(jnp.float32)
    gf = gamma.astype(jnp.float32)
    bf = beta.astype(jnp.float32)
    b2f = b2.astype(jnp.float32)

    # Row tile: as large as requested, multiple of 16 (bf16 sublane packing),
    # never larger than the (padded) row count. Rows are independent, so padded
    # rows are computed and sliced off afterwards.
    tm_eff = min(tm, _round_up(n, 16))
    tm_eff = max(16, _round_up(tm_eff, 16))
    n_pad = _round_up(n, tm_eff)
    if n_pad != n:
        xc = jnp.pad(xc, ((0, n_pad - n), (0, 0)))
    grid = (n_pad // tm_eff,)

    # Scoped-VMEM budget: resident weights (single-buffered) + double-buffered
    # x / out tiles + generous f32 intermediate headroom.
    cb = jnp.dtype(compute_dtype).itemsize
    ob = jnp.dtype(out_dtype).itemsize
    vmem_est = (
        (input_dim * hid_dim + hid_dim * hid_dim) * cb   # resident weights
        + 4 * hid_dim * 4                                # b1, gamma, beta, b2 (f32)
        + 2 * tm_eff * input_dim * cb                    # double-buffered x tiles
        + 2 * tm_eff * hid_dim * ob                      # double-buffered out tiles
        + 8 * tm_eff * hid_dim * 4                       # f32 intermediates headroom
    )
    vmem_limit = int(min(vmem_est + (8 << 20), 112 * 1024 * 1024))

    rows = lambda i: (i, 0)
    # Parameters: whole array resident in VMEM for the entire grid -> single
    # buffer, no per-step DMA.
    # TODO(synk): for very large hid_dim (e.g. >4k on v7x's 64 MiB VMEM) add a
    # second grid axis that streams w2 column tiles instead of keeping it resident.
    resident = pl.BlockSpec(memory_space=pltpu.MemorySpace.VMEM)

    out = pl.pallas_call(
        mlp_kernel,
        out_shape=jax.ShapeDtypeStruct((n_pad, hid_dim), out_dtype),
        grid_spec=pltpu.PrefetchScalarGridSpec(
            num_scalar_prefetch=0,
            grid=grid,
            in_specs=[
                pl.BlockSpec((tm_eff, input_dim), rows),   # x (pipelined row tiles)
                resident,                                  # w1
                resident,                                  # b1
                resident,                                  # gamma
                resident,                                  # beta
                resident,                                  # w2
                resident,                                  # b2
            ],
            out_specs=pl.BlockSpec((tm_eff, hid_dim), rows),
        ),
        compiler_params=pltpu.CompilerParams(
            dimension_semantics=("parallel",),
            vmem_limit_bytes=vmem_limit,
        ),
    )(xc, w1c, b1f, gf, bf, w2c, b2f)

    return out[:n] if n_pad != n else out


def init_params(key, input_dim, hid_dim):
    """Deterministic init matching Mlp._init_weights (xavier_uniform weights,
    normal(std=1e-6) biases, LayerNorm gamma=1 / beta=0)."""
    k1, k2, k3, k4 = jax.random.split(key, 4)
    bound1 = jnp.sqrt(6.0 / (input_dim + hid_dim))
    bound2 = jnp.sqrt(6.0 / (hid_dim + hid_dim))
    # stored as (in, out); xavier_uniform is symmetric in fan_in/fan_out
    w1 = jax.random.uniform(k1, (input_dim, hid_dim), jnp.float32, -bound1, bound1)
    w2 = jax.random.uniform(k2, (hid_dim, hid_dim), jnp.float32, -bound2, bound2)
    b1 = 1e-6 * jax.random.normal(k3, (1, hid_dim), jnp.float32)
    b2 = 1e-6 * jax.random.normal(k4, (1, hid_dim), jnp.float32)
    gamma = jnp.ones((1, hid_dim), jnp.float32)
    beta = jnp.zeros((1, hid_dim), jnp.float32)
    return w1, b1, gamma, beta, w2, b2


def mlp_reference(x, w1, b1, gamma, beta, w2, b2):
    h = x @ w1 + b1
    h = jax.nn.gelu(h, approximate=False)
    mean = jnp.mean(h, axis=-1, keepdims=True)
    var = jnp.mean((h - mean) ** 2, axis=-1, keepdims=True)
    h = (h - mean) * lax.rsqrt(var + 1e-6) * gamma + beta
    return h @ w2 + b2


if __name__ == "__main__":
    key = jax.random.PRNGKey(0)
    k_x, k_p = jax.random.split(key)

    # Small but MXU/lane-friendly shapes: rows multiple of tm, feature dims
    # multiples of 128; grid has 2 steps so v7x can use both TensorCores.
    N, INPUT_DIM, HID_DIM = 512, 128, 256
    x = jax.random.normal(k_x, (N, INPUT_DIM), jnp.float32)
    params = init_params(k_p, INPUT_DIM, HID_DIM)

    out = mlp_forward(x, *params, tm=256)
    out = jax.block_until_ready(out)

    # Reference with matmul inputs rounded to bf16 (matches the kernel's MXU
    # input precision; accumulation and norm math are f32 in both).
    w1, b1, gamma, beta, w2, b2 = params
    rt = lambda a: a.astype(jnp.bfloat16).astype(jnp.float32)
    ref = mlp_reference(rt(x), rt(w1), b1, gamma, beta, rt(w2), b2)

    assert out.shape == (N, HID_DIM)
    assert out.dtype == x.dtype
    assert jnp.allclose(out.astype(jnp.float32), ref, atol=2e-2, rtol=2e-2), (
        float(jnp.max(jnp.abs(out.astype(jnp.float32) - ref))))

    print("KERNEL_OK")
</pallas_src>

<mosaic_0001>
module attributes {stable_mosaic.version = 11 : i64} {
  func.func @mlp_kernel(%arg0: i32, %arg1: memref<256x128xbf16, #tpu.memory_space<vmem>>, %arg2: memref<128x256xbf16, #tpu.memory_space<vmem>>, %arg3: memref<1x256xf32, #tpu.memory_space<vmem>>, %arg4: memref<1x256xf32, #tpu.memory_space<vmem>>, %arg5: memref<1x256xf32, #tpu.memory_space<vmem>>, %arg6: memref<256x256xbf16, #tpu.memory_space<vmem>>, %arg7: memref<1x256xf32, #tpu.memory_space<vmem>>, %arg8: memref<256x256xf32, #tpu.memory_space<vmem>>) attributes {dimension_semantics = [#tpu.dimension_semantics<parallel>], iteration_bounds = array<i64: 2>, scalar_prefetch = 0 : i64, scratch_operands = 0 : i64, tpu.core_type = #tpu.core_type<tc>, window_params = [{transform_indices = @transform_0, window_bounds = array<i64: 256, 128>}, {pipeline_mode = #tpu.pipeline_mode<synchronous>, transform_indices = @transform_1, window_bounds = array<i64: 128, 256>}, {pipeline_mode = #tpu.pipeline_mode<synchronous>, transform_indices = @transform_2, window_bounds = array<i64: 1, 256>}, {pipeline_mode = #tpu.pipeline_mode<synchronous>, transform_indices = @transform_3, window_bounds = array<i64: 1, 256>}, {pipeline_mode = #tpu.pipeline_mode<synchronous>, transform_indices = @transform_4, window_bounds = array<i64: 1, 256>}, {pipeline_mode = #tpu.pipeline_mode<synchronous>, transform_indices = @transform_5, window_bounds = array<i64: 256, 256>}, {pipeline_mode = #tpu.pipeline_mode<synchronous>, transform_indices = @transform_6, window_bounds = array<i64: 1, 256>}, {transform_indices = @transform_7, window_bounds = array<i64: 256, 256>}]} {
    %c0 = arith.constant 0 : index
    %c0_0 = arith.constant 0 : index
    %0 = vector.load %arg1[%c0, %c0_0] : memref<256x128xbf16, #tpu.memory_space<vmem>>, vector<256x128xbf16>
    %c0_1 = arith.constant 0 : index
    %c0_2 = arith.constant 0 : index
    %1 = vector.load %arg2[%c0_1, %c0_2] : memref<128x256xbf16, #tpu.memory_space<vmem>>, vector<128x256xbf16>
    %cst = arith.constant dense<0.000000e+00> : vector<256x256xf32>
    %2 = tpu.matmul %0, %1, %cst {dimension_numbers = #tpu.dot_dimension_numbers<[1], [0], [0], [1], [0, 0, 1, 1], [], []>} : vector<256x128xbf16>, vector<128x256xbf16>, vector<256x256xf32> -> vector<256x256xf32>
    %c0_3 = arith.constant 0 : index
    %c0_4 = arith.constant 0 : index
    %3 = vector.load %arg3[%c0_3, %c0_4] : memref<1x256xf32, #tpu.memory_space<vmem>>, vector<1x256xf32>
    %4 = vector.broadcast %3 : vector<1x256xf32> to vector<256x256xf32>
    %5 = arith.addf %2, %4 : vector<256x256xf32>
    %cst_5 = arith.constant 5.000000e-01 : f32
    %6 = vector.broadcast %cst_5 : f32 to vector<256x256xf32>
    %7 = arith.mulf %6, %5 : vector<256x256xf32>
    %cst_6 = arith.constant 0.707106769 : f32
    %8 = vector.broadcast %cst_6 : f32 to vector<256x256xf32>
    %9 = arith.mulf %5, %8 : vector<256x256xf32>
    %10 = math.erf %9 : vector<256x256xf32>
    %cst_7 = arith.constant 1.000000e+00 : f32
    %11 = vector.broadcast %cst_7 : f32 to vector<256x256xf32>
    %12 = arith.addf %11, %10 : vector<256x256xf32>
    %13 = arith.mulf %7, %12 : vector<256x256xf32>
    %cst_8 = arith.constant dense<0.000000e+00> : vector<256xf32>
    %14 = vector.multi_reduction <add>, %13, %cst_8 [1] : vector<256x256xf32> to vector<256xf32>
    %15 = vector.shape_cast %14 : vector<256xf32> to vector<256x1xf32>
    %cst_9 = arith.constant 2.560000e+02 : f32
    %16 = vector.broadcast %cst_9 : f32 to vector<256x1xf32>
    %17 = arith.divf %15, %16 : vector<256x1xf32>
    %18 = vector.broadcast %17 : vector<256x1xf32> to vector<256x256xf32>
    %19 = arith.subf %13, %18 : vector<256x256xf32>
    %20 = arith.mulf %19, %19 : vector<256x256xf32>
    %cst_10 = arith.constant dense<0.000000e+00> : vector<256xf32>
    %21 = vector.multi_reduction <add>, %20, %cst_10 [1] : vector<256x256xf32> to vector<256xf32>
    %22 = vector.shape_cast %21 : vector<256xf32> to vector<256x1xf32>
    %cst_11 = arith.constant 2.560000e+02 : f32
    %23 = vector.broadcast %cst_11 : f32 to vector<256x1xf32>
    %24 = arith.divf %22, %23 : vector<256x1xf32>
    %cst_12 = arith.constant 9.99999997E-7 : f32
    %25 = vector.broadcast %cst_12 : f32 to vector<256x1xf32>
    %26 = arith.addf %24, %25 : vector<256x1xf32>
    %27 = math.rsqrt %26 : vector<256x1xf32>
    %28 = vector.broadcast %27 : vector<256x1xf32> to vector<256x256xf32>
    %29 = arith.mulf %19, %28 : vector<256x256xf32>
    %c0_13 = arith.constant 0 : index
    %c0_14 = arith.constant 0 : index
    %30 = vector.load %arg4[%c0_13, %c0_14] : memref<1x256xf32, #tpu.memory_space<vmem>>, vector<1x256xf32>
    %31 = vector.broadcast %30 : vector<1x256xf32> to vector<256x256xf32>
    %32 = arith.mulf %29, %31 : vector<256x256xf32>
    %c0_15 = arith.constant 0 : index
    %c0_16 = arith.constant 0 : index
    %33 = vector.load %arg5[%c0_15, %c0_16] : memref<1x256xf32, #tpu.memory_space<vmem>>, vector<1x256xf32>
    %34 = vector.broadcast %33 : vector<1x256xf32> to vector<256x256xf32>
    %35 = arith.addf %32, %34 : vector<256x256xf32>
    %36 = arith.truncf %35 : vector<256x256xf32> to vector<256x256xbf16>
    %c0_17 = arith.constant 0 : index
    %c0_18 = arith.constant 0 : index
    %37 = vector.load %arg6[%c0_17, %c0_18] : memref<256x256xbf16, #tpu.memory_space<vmem>>, vector<256x256xbf16>
    %cst_19 = arith.constant dense<0.000000e+00> : vector<256x256xf32>
    %38 = tpu.matmul %36, %37, %cst_19 {dimension_numbers = #tpu.dot_dimension_numbers<[1], [0], [0], [1], [0, 0, 1, 1], [], []>} : vector<256x256xbf16>, vector<256x256xbf16>, vector<256x256xf32> -> vector<256x256xf32>
    %c0_20 = arith.constant 0 : index
    %c0_21 = arith.constant 0 : index
    %39 = vector.load %arg7[%c0_20, %c0_21] : memref<1x256xf32, #tpu.memory_space<vmem>>, vector<1x256xf32>
    %40 = vector.broadcast %39 : vector<1x256xf32> to vector<256x256xf32>
    %41 = arith.addf %38, %40 : vector<256x256xf32>
    %c0_22 = arith.constant 0 : index
    %c0_23 = arith.constant 0 : index
    %42 = vector.load %arg8[%c0_22, %c0_23] : memref<256x256xf32, #tpu.memory_space<vmem>>, vector<256x256xf32>
    tpu.vector_store %arg8[%c0_22, %c0_23], %41 {strides = array<i32>} : memref<256x256xf32, #tpu.memory_space<vmem>>, vector<256x256xf32>,
    return
  }
  func.func @transform_0(%arg0: i32) -> (i32, i32) {
    %c0_i32 = arith.constant 0 : i32
    %c0_i32_0 = arith.constant 0 : i32
    return %arg0, %c0_i32 : i32, i32
  }
  func.func @transform_1(%arg0: i32) -> (i32, i32) {
    %c0_i32 = arith.constant 0 : i32
    %c0_i32_0 = arith.constant 0 : i32
    %c0_i32_1 = arith.constant 0 : i32
    return %c0_i32, %c0_i32_0 : i32, i32
  }
  func.func @transform_2(%arg0: i32) -> (i32, i32) {
    %c0_i32 = arith.constant 0 : i32
    %c0_i32_0 = arith.constant 0 : i32
    %c0_i32_1 = arith.constant 0 : i32
    return %c0_i32, %c0_i32_0 : i32, i32
  }
  func.func @transform_3(%arg0: i32) -> (i32, i32) {
    %c0_i32 = arith.constant 0 : i32
    %c0_i32_0 = arith.constant 0 : i32
    %c0_i32_1 = arith.constant 0 : i32
    return %c0_i32, %c0_i32_0 : i32, i32
  }
  func.func @transform_4(%arg0: i32) -> (i32, i32) {
    %c0_i32 = arith.constant 0 : i32
    %c0_i32_0 = arith.constant 0 : i32
    %c0_i32_1 = arith.constant 0 : i32
    return %c0_i32, %c0_i32_0 : i32, i32
  }
  func.func @transform_5(%arg0: i32) -> (i32, i32) {
    %c0_i32 = arith.constant 0 : i32
    %c0_i32_0 = arith.constant 0 : i32
    %c0_i32_1 = arith.constant 0 : i32
    return %c0_i32, %c0_i32_0 : i32, i32
  }
  func.func @transform_6(%arg0: i32) -> (i32, i32) {
    %c0_i32 = arith.constant 0 : i32
    %c0_i32_0 = arith.constant 0 : i32
    %c0_i32_1 = arith.constant 0 : i32
    return %c0_i32, %c0_i32_0 : i32, i32
  }
  func.func @transform_7(%arg0: i32) -> (i32, i32) {
    %c0_i32 = arith.constant 0 : i32
    %c0_i32_0 = arith.constant 0 : i32
    return %arg0, %c0_i32 : i32, i32
  }
}

</mosaic_0001>

<bundles_post_ra>
// kernel: mlp_forward.1
= control target key start
LH: loop header
LB: loop body
LE: loop exit
PB: predicated region body
PF: predicated region fallthrough
CT: control target
= control target key end

     0   :  { %12 = vsyncpa [#allocation3], 0  ;;  %s4262_s0 = inlined_call_operand.vmem [shape: bf16[512,128], index: 0, kind: input, shape index: {}]   ;;  %s4263_s1 = inlined_call_operand.vmem [shape: bf16[128,256], index: 1, kind: input, shape index: {}]   ;;  %s4264_s2 = inlined_call_operand.vmem [shape: f32[1,256], index: 2, kind: input, shape index: {}]   ;;  %s4265_s3 = inlined_call_operand.vmem [shape: f32[1,256], index: 3, kind: input, shape index: {}]   ;;  %s4266_s4 = inlined_call_operand.vmem [shape: f32[1,256], index: 4, kind: input, shape index: {}]   ;;  %s4267_s5 = inlined_call_operand.vmem [shape: bf16[256,256], index: 5, kind: input, shape index: {}]   ;;  %s4268_s6 = inlined_call_operand.vmem [shape: f32[1,256], index: 6, kind: input, shape index: {}]   ;;  %s4269_s7 = inlined_call_operand.hbm [shape: f32[512,256], index: 7, kind: output, shape index: {}]  }
   0x1   :  { %14 = vsyncpa [#allocation3 + $0x1], 0  ;;  %s2804_s24 = smov 0   ;;  %s2806_s25 = smov 0  }
   0x2   :  { %s2808_s26 = smov 0   ;;  %s2810_s27 = smov 0  }
   0x3 LB: > { %s2825_s28 = sadd.s32 4294967295, %s2758_s27   ;;  %s2265_s29 = sadd.s32 4294967294, %s2758_s27   ;;  %s2758_s27 = sphi %s2810_s27, %s4419_s27   ;;  %s2754_s26 = sphi %s2808_s26, %s4418_s26   ;;  %s2750_s25 = sphi %s2806_s25, %s4417_s25   ;;  %s2746_s24 = sphi %s2804_s24, %s4416_s24  }
   0x4   : > { %s2829_s30 = sadd.s32 1, %s2758_s27   ;;  %s179_s8 = sadd.s32 1, %s2754_s26 }
   0x5   : > { %s176_s9 = ssub.s32 %s2758_s27, %s2829_s30  ;;  %p189_p0 = scmp.ne.s32.totalorder %s2754_s26, %s2750_s25 }
   0x6   : > { %p177_p1 = scmp.eq.s32.totalorder %s176_s9, 0  ;;  %p190_p2 = scmp.eq.s32.totalorder %s2825_s28, 1 }
   0x7   : > { %p195_p3 = scmp.ne.s32.totalorder %s2750_s25, %s2746_s24  ;;  %p196_p4 = scmp.eq.s32.totalorder %s2265_s29, 1 }
   0x8   : > { %s2840_s10 = scalar_select %p177_p1, %s2754_s26, %s179_s8  }
   0x9   : > { %p2842_p5 = por %p190_p2, %p189_p0  ;;  %p2846_p6 = por %p196_p4, %p195_p3 }
   0xa   : > { %p2268_p7 = scmp.ge.s32.totalorder %s2758_s27, 1  ;;  %p241_p8 = scmp.lt.s32.totalorder %s2758_s27, 3 }
   0xc   : > { %p242_p9 = pnand %p2268_p7, %p241_p8 }
   0xe   : > { %245 = sbr.rel (%p242_p9) target bundleno = 992 (0x3e0), region = 48 }
  0x13   : > { %v2418_v0 = vld [vmem:[%s4263_s1 + $0x74] ss:$8 sps:$4 sm:$0xff]   ;;  %s2270_s15 = sshll.u32 %s2825_s28, 5  ;;  %v2420_v1 = vld [vmem:[%s4263_s1 + $0x70] ss:$8 sps:$4 sm:$0xff]   ;;  %v2760_v2 = vmov 0   ;;  %v331_v35 = vlaneseq }
  0x14   : > { %549 = vmatprep.mubr.bf16.mxu0 %v2760_v2  ;;  %p274_p10 = scmp.lt.s32.totalorder %s2270_s15, 63  ;;  %517 = vmatprep.subr.bf16.mxu0 %v2418_v0  ;;  %v2421_v3 = vld [vmem:[%s4263_s1 + $0x64] ss:$8 sps:$4 sm:$0xff]   ;;  %v2423_v4 = vld [vmem:[%s4263_s1 + $0x60] ss:$8 sps:$4 sm:$0xff]   ;;  %s270_s23 = sand.u32 1, %s2750_s25  }
  0x15   : > { %518 = vmatpush1.bf16.msra.mxu0 %v2420_v1  ;;  %v2424_v5 = vld [vmem:[%s4263_s1 + $0x54] ss:$8 sps:$4 sm:$0xff]   ;;  %v2426_v6 = vld [vmem:[%s4263_s1 + $0x50] ss:$8 sps:$4 sm:$0xff]   ;;  %v2427_v7 = vld [vmem:[%s4263_s1 + $0x44] ss:$8 sps:$4 sm:$0xff]  }
  0x16   : > { %s4421_s15 = smov (!%p274_p10, %s2270_s15), 63  ;;  %519 = vmatprep.subr.bf16.mxu0 %v2421_v3  ;;  %v2429_v8 = vld [vmem:[%s4263_s1 + $0x40] ss:$8 sps:$4 sm:$0xff]   ;;  %v2430_v9 = vld [vmem:[%s4263_s1 + $0x34] ss:$8 sps:$4 sm:$0xff]   ;;  %v332_v38 = vshrl.u32 %v331_v35, 7 }
  0x17   : > { %s2271_s29 = sshll.u32 %s4421_s15, 2  ;;  %v2432_v10 = vld [vmem:[%s4263_s1 + $0x30] ss:$8 sps:$4 sm:$0xff]   ;;  %v2433_v11 = vld [vmem:[%s4263_s1 + $0x24] ss:$8 sps:$4 sm:$0xff]   ;;  %s2343_s13 = sshll.u32 %s2825_s28, 13 }
  0x18   : > { %s2878_s18 = scalar_lea.vmem %s4262_s0, %s2271_s29  ;;  %v2435_v12 = vld [vmem:[%s4263_s1 + $0x20] ss:$8 sps:$4 sm:$0xff]   ;;  %v2436_v13 = vld [vmem:[%s4263_s1 + $0x14] ss:$8 sps:$4 sm:$0xff]   ;;  %v2438_v14 = vld [vmem:[%s4263_s1 + $0x10] ss:$8 sps:$4 sm:$0xff]   ;;  %s4213_s19 = scalar_lea.hbm %s4269_s7, %s2343_s13 }
  0x19   : > { %520 = vmatpush1.bf16.msra.mxu0 %v2423_v4  ;;  %v2439_v15 = vld [vmem:[%s4263_s1 + $0x4] ss:$8 sps:$4 sm:$0xff]   ;;  %v2441_v16 = vld [vmem:[%s4263_s1] ss:$8 sps:$4 sm:$0xff]   ;;  %v2444_v19 = vld [vmem:[%s2878_s18 + $0x10] sm:$0xff]   ;;  %v2950_v41 = vsub.s32 0, %v332_v38 }
  0x1a   : > { %521 = vmatprep.subr.bf16.mxu0 %v2424_v5  ;;  %v2442_v17 = vld [vmem:[%s2878_s18] sm:$0xff]   ;;  %v2443_v18 = vld [vmem:[%s2878_s18 + $0x8] sm:$0xff]   ;;  %v2445_v20 = vld [vmem:[%s2878_s18 + $0x18] sm:$0xff]   ;;  %v2957_v44 = vsub.s32 1, %v332_v38  ;;  %s2269_s29 = sshll.u32 %s270_s23, 9  ;;  %s4222_s28 = scalar_lea.sflag [#allocation3], %s270_s23 }
  0x1b   : > { %v2446_v21 = vld [vmem:[%s2878_s18 + $0x20] sm:$0xff]   ;;  %v2447_v22 = vld [vmem:[%s2878_s18 + $0x28] sm:$0xff]   ;;  %v2448_v23 = vld [vmem:[%s2878_s18 + $0x30] sm:$0xff]   ;;  %4322 = vst [vmem:[#allocation5_spill] sm:$0xff] %v2950_v41  ;;  %s4082_s9 = scalar_lea.vmem [#allocation2], %s2269_s29  ;;  %s2761_s15 = smov [#allocation2]  }
  0x1c   : > { %v2449_v24 = vld [vmem:[%s2878_s18 + $0x38] sm:$0xff]   ;;  %v2450_v25 = vld [vmem:[%s2878_s18 + $0x40] sm:$0xff]   ;;  %v2451_v26 = vld [vmem:[%s2878_s18 + $0x48] sm:$0xff]   ;;  %4323 = vst [vmem:[#allocation6_spill] sm:$0xff] %v2957_v44  ;;  %s2203_s14 = sshll.u32 %s4082_s9, 4  ;;  %s2702_s21 = sshll.u32 %s2761_s15, 4  ;;  %s4215_s14 = int_to_ptr.vmem [resolvable:$true] %s2203_s14  ;;  %s2703_s21 = int_to_ptr.vmem [resolvable:$false] %s2702_s21 }
  0x1d   : > { %522 = vmatpush1.bf16.msra.mxu0 %v2426_v6  ;;  %v2452_v27 = vld [vmem:[%s2878_s18 + $0x50] sm:$0xff]   ;;  %v2453_v28 = vld [vmem:[%s2878_s18 + $0x58] sm:$0xff]   ;;  %v2454_v29 = vld [vmem:[%s2878_s18 + $0x60] sm:$0xff]   ;;  %s2698_s20 = scalar_lea.vmem %s4215_s14, 8192  ;;  %s2704_s22 = scalar_lea.vmem %s2703_s21, 16384 }
  0x1e   : > { %523 = vmatprep.subr.bf16.mxu0 %v2427_v7  ;;  %v2455_v30 = vld [vmem:[%s2878_s18 + $0x68] sm:$0xff]   ;;  %v2456_v31 = vld [vmem:[%s2878_s18 + $0x70] sm:$0xff]   ;;  %v2457_v32 = vld [vmem:[%s2878_s18 + $0x78] sm:$0xff]   ;;  %p2699_p11 = scmp.ne.s32.totalorder %s4215_s14, %s2698_s20  ;;  %p2705_p0 = scmp.lt.s32.totalorder %s4215_s14, %s2703_s21 }
  0x1f   : > { %v329_v42 = vld [vmem:[%s4264_s2] sm:$0x3]  ;;  %p2706_p1 = scmp.lt.s32.totalorder %s2704_s22, %s2698_s20 }
  0x20   : > { %v2962_v46 = vrot.slane %v329_v42, %v2950_v41  ;;  %v2965_v48 = vrot.slane %v329_v42, %v2957_v44  ;;  %p2700_p12 = pnand %p2699_p11, %p2842_p5 }
  0x21   : > { %524 = vmatpush1.bf16.msra.mxu0 %v2429_v8  ;;  %p2707_p2 = por %p2706_p1, %p2705_p0 }
  0x22   : > { %525 = vmatprep.subr.bf16.mxu0 %v2430_v9  ;;  %p2701_p13 = pneg %p2700_p12 }
  0x24   : > { %p2708_p3 = pnand %p2707_p2, %p2701_p13 }
  0x25   : > { %526 = vmatpush1.bf16.msra.mxu0 %v2432_v10 }
  0x26   : > { %527 = vmatprep.subr.bf16.mxu0 %v2433_v11 }
  0x29   : > { %528 = vmatpush1.bf16.msra.mxu0 %v2435_v12 }
  0x2a   : > { %529 = vmatprep.subr.bf16.mxu0 %v2436_v13 }
  0x2d   : > { %530 = vmatpush1.bf16.msra.mxu0 %v2438_v14 }
  0x2e   : > { %531 = vmatprep.subr.bf16.mxu0 %v2439_v15 }
  0x31   : > { %532 = vmatpush1.bf16.msra.mxu0 %v2441_v16 }
  0x34   : > { %550 = vmatmul.mubr.bf16.vlgmr.msra.gmra.mxu0 %v2442_v17 }
  0x35   : > { %559 = vmatprep.mubr.bf16.mxu0 %v2760_v2 }
  0x3c   : > { %560 = vmatmul.mubr.bf16.gmra.mxu0 %v2443_v18 }
  0x3d   : > { %569 = vmatprep.mubr.bf16.mxu0 %v2760_v2 }
  0x44   : > { %570 = vmatmul.mubr.bf16.gmra.mxu0 %v2444_v19 }
  0x45   : > { %579 = vmatprep.mubr.bf16.mxu0 %v2760_v2 }
  0x4c   : > { %580 = vmatmul.mubr.bf16.gmra.mxu0 %v2445_v20 }
  0x4d   : > { %589 = vmatprep.mubr.bf16.mxu0 %v2760_v2 }
  0x54   : > { %590 = vmatmul.mubr.bf16.gmra.mxu0 %v2446_v21 }
  0x55   : > { %599 = vmatprep.mubr.bf16.mxu0 %v2760_v2 }
  0x5c   : > { %600 = vmatmul.mubr.bf16.gmra.mxu0 %v2447_v22 }
  0x5d   : > { %609 = vmatprep.mubr.bf16.mxu0 %v2760_v2 }
  0x64   : > { %610 = vmatmul.mubr.bf16.gmra.mxu0 %v2448_v23 }
  0x65   : > { %619 = vmatprep.mubr.bf16.mxu0 %v2760_v2 }
  0x6c   : > { %620 = vmatmul.mubr.bf16.gmra.mxu0 %v2449_v24 }
  0x6d   : > { %629 = vmatprep.mubr.bf16.mxu0 %v2760_v2 }
  0x74   : > { %630 = vmatmul.mubr.bf16.gmra.mxu0 %v2450_v25 }
  0x75   : > { %639 = vmatprep.mubr.bf16.mxu0 %v2760_v2 }
  0x7c   : > { %640 = vmatmul.mubr.bf16.gmra.mxu0 %v2451_v26 }
  0x7d   : > { %649 = vmatprep.mubr.bf16.mxu0 %v2760_v2 }
  0x84   : > { %650 = vmatmul.mubr.bf16.gmra.mxu0 %v2452_v27 }
  0x85   : > { %659 = vmatprep.mubr.bf16.mxu0 %v2760_v2 }
  0x8c   : > { %660 = vmatmul.mubr.bf16.gmra.mxu0 %v2453_v28 }
  0x8d   : > { %669 = vmatprep.mubr.bf16.mxu0 %v2760_v2 }
  0x94   : > { %670 = vmatmul.mubr.bf16.gmra.mxu0 %v2454_v29 }
  0x95   : > { %679 = vmatprep.mubr.bf16.mxu0 %v2760_v2 }
  0x9c   : > { %680 = vmatmul.mubr.bf16.gmra.mxu0 %v2455_v30 }
  0x9d   : > { %689 = vmatprep.mubr.bf16.mxu0 %v2760_v2 }
  0xa4   : > { %690 = vmatmul.mubr.bf16.gmra.mxu0 %v2456_v31 }
  0xa5   : > { %699 = vmatprep.mubr.bf16.mxu0 %v2760_v2 }
  0xac   : > { %700 = vmatmul.mubr.bf16.gmra.mxu0 %v2457_v32 }
  0xf4   : > { %v2938_v33 = vpop.f32.mrf.mxu0 }
  0xf6   : > { %v2940_v34 = vpop.f32.mrf.mxu0 }
  0xf8   : > { %v2942_v36 = vpop.f32.mrf.mxu0 }
  0xfa   : > { %v2944_v37 = vpop.f32.mrf.mxu0 }
  0xfc   : > { %v2946_v39 = vpop.f32.mrf.mxu0 }
  0xfe   : > { %v2948_v40 = vpop.f32.mrf.mxu0 }
 0x100   : > { %v2955_v43 = vpop.f32.mrf.mxu0 }
 0x102   : > { %v2959_v45 = vpop.f32.mrf.mxu0 }
 0x104   : > { %v571_v47 = vpop.f32.mrf.mxu0 }
 0x105   : > { %v572_v49 = vadd.f32 %v571_v47, %v2962_v46 }
 0x106   : > { %v573_v50 = vpop.f32.mrf.mxu0 }
 0x107   : > { %v782_v51 = vmul.f32 0.70710677, %v572_v49  ;;  %v574_v52 = vadd.f32 %v573_v50, %v2965_v48  ;;  %v718_v20 = vmul.f32 0.5, %v572_v49 }
 0x108   : > { %v575_v53 = vpop.f32.mrf.mxu0 }
 0x109   : > { %2506 = verf.f32 %v782_v51  ;;  %v783_v54 = vmul.f32 0.70710677, %v574_v52  ;;  %v576_v55 = vadd.f32 %v575_v53, %v2962_v46  ;;  %v719_v21 = vmul.f32 0.5, %v574_v52 }
 0x10a   : > { %v577_v56 = vpop.f32.mrf.mxu0 }
 0x10b   : > { %2508 = verf.f32 %v783_v54  ;;  %v784_v57 = vmul.f32 0.70710677, %v576_v55  ;;  %v578_v58 = vadd.f32 %v577_v56, %v2965_v48  ;;  %v720_v38 = vmul.f32 0.5, %v576_v55 }
 0x10c   : > { %v581_v59 = vpop.f32.mrf.mxu0 }
 0x10d   : > { %2510 = verf.f32 %v784_v57  ;;  %v785_v60 = vmul.f32 0.70710677, %v578_v58  ;;  %v582_v61 = vadd.f32 %v581_v59, %v2962_v46  ;;  %v721_v42 = vmul.f32 0.5, %v578_v58 }
 0x10e   : > { %v583_v62 = vpop.f32.mrf.mxu0 }
 0x10f   : > { %2512 = verf.f32 %v785_v60  ;;  %v786_v63 = vmul.f32 0.70710677, %v582_v61  ;;  %v584_v0 = vadd.f32 %v583_v62, %v2965_v48  ;;  %v722_v62 = vmul.f32 0.5, %v582_v61 }
 0x110   : > { %v585_v1 = vpop.f32.mrf.mxu0 }
 0x111   : > { %2514 = verf.f32 %v786_v63  ;;  %v787_v2 = vmul.f32 0.70710677, %v584_v0  ;;  %v2974_v3 = vadd.f32 %v585_v1, %v2962_v46  ;;  %v723_v63 = vmul.f32 0.5, %v584_v0 }
 0x112   : > { %v587_v4 = vpop.f32.mrf.mxu0 }
 0x113   : > { %2516 = verf.f32 %v787_v2  ;;  %v788_v5 = vmul.f32 0.70710677, %v2974_v3  ;;  %v2978_v6 = vadd.f32 %v587_v4, %v2965_v48 }
 0x114   : > { %v591_v7 = vpop.f32.mrf.mxu0 }
 0x115   : > { %2518 = verf.f32 %v788_v5  ;;  %v789_v8 = vmul.f32 0.70710677, %v2978_v6  ;;  %v2982_v9 = vadd.f32 %v591_v7, %v2962_v46 }
 0x116   : > { %v2507_v10 = vpop.eup %2506  ;;  %v593_v11 = vpop.f32.mrf.mxu0 }
 0x117   : > { %2520 = verf.f32 %v789_v8  ;;  %v790_v12 = vmul.f32 0.70710677, %v2982_v9  ;;  %v2986_v13 = vadd.f32 %v593_v11, %v2965_v48  ;;  %v910_v16 = vadd.f32 1.0, %v2507_v10 }
 0x118   : > { %v2509_v14 = vpop.eup %2508  ;;  %v595_v15 = vpop.f32.mrf.mxu0 }
 0x119   : > { %2522 = verf.f32 %v790_v12  ;;  %v791_v17 = vmul.f32 0.70710677, %v2986_v13  ;;  %v2990_v18 = vadd.f32 %v595_v15, %v2962_v46  ;;  %v911_v23 = vadd.f32 1.0, %v2509_v14 }
 0x11a   : > { %v2511_v19 = vpop.eup %2510  ;;  %v597_v22 = vpop.f32.mrf.mxu0  ;;  %v2996_v28 = vmul.f32 %v910_v16, %v718_v20  ;;  %v724_v16 = vmul.f32 0.5, %v2974_v3 }
 0x11b   : > { %2524 = verf.f32 %v791_v17  ;;  %v792_v24 = vmul.f32 0.70710677, %v2990_v18  ;;  %v2994_v25 = vadd.f32 %v597_v22, %v2965_v48  ;;  %v2998_v29 = vmul.f32 %v911_v23, %v719_v21 }
 0x11c   : > { %v2513_v26 = vpop.eup %2512  ;;  %v601_v27 = vpop.f32.mrf.mxu0  ;;  %v912_v30 = vadd.f32 1.0, %v2511_v19  ;;  %v725_v17 = vmul.f32 0.5, %v2978_v6 }
 0x11d   : > { %2526 = verf.f32 %v792_v24  ;;  %v793_v31 = vmul.f32 0.70710677, %v2994_v25  ;;  %v3002_v32 = vadd.f32 %v601_v27, %v2962_v46  ;;  %v1042_v49 = vadd.f32 %v2998_v29, %v2996_v28 }
 0x11e   : > { %v2515_v35 = vpop.eup %2514  ;;  %v603_v47 = vpop.f32.mrf.mxu0  ;;  %v913_v50 = vadd.f32 1.0, %v2513_v26  ;;  %v3010_v56 = vmul.f32 %v912_v30, %v720_v38  ;;  %v726_v38 = vmul.f32 0.5, %v2982_v9 }
 0x11f   : > { %2528 = verf.f32 %v793_v31  ;;  %v794_v51 = vmul.f32 0.70710677, %v3002_v32  ;;  %v3008_v52 = vadd.f32 %v603_v47, %v2965_v48  ;;  %1043 = vadd.xlane.f32.xlu0 %v1042_v49  ;;  %v914_v55 = vadd.f32 1.0, %v2515_v35 }
 0x120   : > { %v2517_v53 = vpop.eup %2516  ;;  %v605_v54 = vpop.f32.mrf.mxu0  ;;  %v3012_v57 = vmul.f32 %v913_v50, %v721_v42  ;;  %v727_v42 = vmul.f32 0.5, %v2986_v13 }
 0x121   : > { %2530 = verf.f32 %v794_v51  ;;  %v795_v58 = vmul.f32 0.70710677, %v3008_v52  ;;  %v3016_v59 = vadd.f32 %v605_v54, %v2962_v46  ;;  %v915_v4 = vadd.f32 1.0, %v2517_v53 }
 0x122   : > { %v2519_v60 = vpop.eup %2518  ;;  %v607_v1 = vpop.f32.mrf.mxu0  ;;  %v1045_v2 = vadd.f32 %v3012_v57, %v3010_v56  ;;  %v3024_v11 = vmul.f32 %v914_v55, %v722_v62 }
 0x123   : > { %2532 = verf.f32 %v795_v58  ;;  %v796_v5 = vmul.f32 0.70710677, %v3016_v59  ;;  %v3022_v7 = vadd.f32 %v607_v1, %v2965_v48  ;;  %v3026_v12 = vmul.f32 %v915_v4, %v723_v63 }
 0x124   : > { %v2521_v8 = vpop.eup %2520  ;;  %1046 = vadd.xlane.f32.xlu0 %v1045_v2  ;;  %v611_v10 = vpop.f32.mrf.mxu0  ;;  %v916_v61 = vadd.f32 1.0, %v2519_v60  ;;  %v728_v1 = vmul.f32 0.5, %v2990_v18  ;;  %v729_v2 = vmul.f32 0.5, %v2994_v25 }
 0x125   : > { %2534 = verf.f32 %v796_v5  ;;  %v797_v0 = vmul.f32 0.70710677, %v3022_v7  ;;  %v3030_v14 = vadd.f32 %v611_v10, %v2962_v46  ;;  %v1048_v20 = vadd.f32 %v3026_v12, %v3024_v11 }
 0x126   : > { %v2523_v15 = vpop.eup %2522  ;;  %v613_v19 = vpop.f32.mrf.mxu0  ;;  %v917_v21 = vadd.f32 1.0, %v2521_v8  ;;  %v3040_v27 = vmul.f32 %v916_v61, %v724_v16 }
 0x127   : > { %2536 = verf.f32 %v797_v0  ;;  %v798_v22 = vmul.f32 0.70710677, %v3030_v14  ;;  %v3038_v23 = vadd.f32 %v613_v19, %v2965_v48  ;;  %1049 = vadd.xlane.f32.xlu1 %v1048_v20  ;;  %v918_v3 = vadd.f32 1.0, %v2523_v15 }
 0x128   : > { %v2525_v24 = vpop.eup %2524  ;;  %v615_v26 = vpop.f32.mrf.mxu0  ;;  %v3042_v30 = vmul.f32 %v917_v21, %v725_v17  ;;  %v730_v21 = vmul.f32 0.5, %v3002_v32 }
 0x129   : > { %2538 = verf.f32 %v798_v22  ;;  %v799_v6 = vmul.f32 0.70710677, %v3038_v23  ;;  %v3046_v31 = vadd.f32 %v615_v26, %v2962_v46  ;;  %v919_v50 = vadd.f32 1.0, %v2525_v24 }
 0x12a   : > { %v2527_v35 = vpop.eup %2526  ;;  %v617_v47 = vpop.f32.mrf.mxu0  ;;  %v1051_v49 = vadd.f32 %v3042_v30, %v3040_v27  ;;  %v3056_v58 = vmul.f32 %v918_v3, %v726_v38  ;;  %v731_v22 = vmul.f32 0.5, %v3008_v52  ;;  %v732_v52 = vmul.f32 0.5, %v3016_v59 }
 0x12b   : > { %2540 = verf.f32 %v799_v6  ;;  %v800_v51 = vmul.f32 0.70710677, %v3046_v31  ;;  %v3054_v53 = vadd.f32 %v617_v47, %v2965_v48  ;;  %v3058_v60 = vmul.f32 %v919_v50, %v727_v42 }
 0x12c   : > { %v2529_v54 = vpop.eup %2528  ;;  %1052 = vadd.xlane.f32.xlu1 %v1051_v49  ;;  %v621_v55 = vpop.f32.mrf.mxu0  ;;  %v920_v9 = vadd.f32 1.0, %v2527_v35 }
 0x12d   : > { %2542 = verf.f32 %v800_v51  ;;  %v801_v13 = vmul.f32 0.70710677, %v3054_v53  ;;  %v3062_v62 = vadd.f32 %v621_v55, %v2962_v46  ;;  %v1054_v5 = vadd.f32 %v3058_v60, %v3056_v58 }
 0x12e   : > { %v2531_v63 = vpop.eup %2530  ;;  %v623_v4 = vpop.f32.mrf.mxu0  ;;  %v921_v8 = vadd.f32 1.0, %v2529_v54  ;;  %v3072_v16 = vmul.f32 %v920_v9, %v728_v1  ;;  %v733_v55 = vmul.f32 0.5, %v3022_v7  ;;  %v734_v9 = vmul.f32 0.5, %v3030_v14 }
 0x12f   : > { %2544 = verf.f32 %v801_v13  ;;  %v802_v10 = vmul.f32 0.70710677, %v3062_v62  ;;  %v3070_v61 = vadd.f32 %v623_v4, %v2965_v48  ;;  %1055 = vadd.xlane.f32.xlu0 %v1054_v5  ;;  %v922_v18 = vadd.f32 1.0, %v2531_v63 }
 0x130   : > { %v2533_v0 = vpop.eup %2532  ;;  %v625_v15 = vpop.f32.mrf.mxu0  ;;  %v3074_v17 = vmul.f32 %v921_v8, %v729_v2  ;;  %v735_v5 = vmul.f32 0.5, %v3038_v23 }
 0x131   : > { %2546 = verf.f32 %v802_v10  ;;  %v803_v25 = vmul.f32 0.70710677, %v3070_v61  ;;  %v3078_v19 = vadd.f32 %v625_v15, %v2962_v46  ;;  %v923_v3 = vadd.f32 1.0, %v2533_v0 }
 0x132   : > { %v2535_v20 = vpop.eup %2534  ;;  %v627_v24 = vpop.f32.mrf.mxu0  ;;  %v1057_v26 = vadd.f32 %v3074_v17, %v3072_v16  ;;  %v3088_v47 = vmul.f32 %v922_v18, %v730_v21 }
 0x133   : > { %2548 = verf.f32 %v803_v25  ;;  %v804_v6 = vmul.f32 0.70710677, %v3078_v19  ;;  %v3086_v35 = vadd.f32 %v627_v24, %v2965_v48  ;;  %v3090_v49 = vmul.f32 %v923_v3, %v731_v22 }
 0x134   : > { %v2537_v38 = vpop.eup %2536  ;;  %1058 = vadd.xlane.f32.xlu1 %v1057_v26  ;;  %v631_v42 = vpop.f32.mrf.mxu0  ;;  %v924_v32 = vadd.f32 1.0, %v2535_v20  ;;  %v736_v25 = vmul.f32 0.5, %v3046_v31 }
 0x135   : > { %2550 = verf.f32 %v804_v6  ;;  %v805_v50 = vmul.f32 0.70710677, %v3086_v35  ;;  %v3095_v51 = vadd.f32 %v631_v42, %v2962_v46  ;;  %v1060_v63 = vadd.f32 %v3090_v49, %v3088_v47 }
 0x136   : > { %v2539_v54 = vpop.eup %2538  ;;  %v633_v13 = vpop.f32.mrf.mxu0  ;;  %v925_v1 = vadd.f32 1.0, %v2537_v38  ;;  %v3106_v10 = vmul.f32 %v924_v32, %v732_v52  ;;  %v737_v6 = vmul.f32 0.5, %v3054_v53 }
 0x137   : > { %2552 = verf.f32 %v805_v50  ;;  %v806_v2 = vmul.f32 0.70710677, %v3095_v51  ;;  %v3103_v59 = vadd.f32 %v633_v13, %v2965_v48  ;;  %1061 = vadd.xlane.f32.xlu0 %v1060_v63  ;;  %v926_v14 = vadd.f32 1.0, %v2539_v54 }
 0x138   : > { %v2541_v4 = vpop.eup %2540  ;;  %v635_v8 = vpop.f32.mrf.mxu0  ;;  %v3108_v7 = vmul.f32 %v925_v1, %v733_v55  ;;  %v738_v54 = vmul.f32 0.5, %v3062_v62 }
 0x139   : > { %2554 = verf.f32 %v806_v2  ;;  %v807_v0 = vmul.f32 0.70710677, %v3103_v59  ;;  %v3112_v15 = vadd.f32 %v635_v8, %v2962_v46  ;;  %v927_v21 = vadd.f32 1.0, %v2541_v4 }
 0x13a   : > { %v2543_v18 = vpop.eup %2542  ;;  %v637_v20 = vpop.f32.mrf.mxu0  ;;  %v1063_v23 = vadd.f32 %v3108_v7, %v3106_v10  ;;  %v3117_v22 = vmul.f32 %v926_v14, %v734_v9  ;;  %v739_v4 = vmul.f32 0.5, %v3070_v61 }
 0x13b   : > { %2556 = verf.f32 %v807_v0  ;;  %v808_v24 = vmul.f32 0.70710677, %v3112_v15  ;;  %v3121_v26 = vadd.f32 %v637_v20, %v2965_v48  ;;  %v3124_v42 = vmul.f32 %v927_v21, %v735_v5 }
 0x13c   : > { %v2545_v3 = vpop.eup %2544  ;;  %1064 = vadd.xlane.f32.xlu1 %v1063_v23  ;;  %v641_v38 = vpop.f32.mrf.mxu0  ;;  %v928_v31 = vadd.f32 1.0, %v2543_v18 }
 0x13d   : > { %2558 = verf.f32 %v808_v24  ;;  %v809_v32 = vmul.f32 0.70710677, %v3121_v26  ;;  %v3128_v52 = vadd.f32 %v641_v38, %v2962_v46  ;;  %v1066_v9 = vadd.f32 %v3124_v42, %v3117_v22 }
 0x13e   : > { %v2547_v50 = vpop.eup %2546  ;;  %v643_v55 = vpop.f32.mrf.mxu0  ;;  %v929_v13 = vadd.f32 1.0, %v2545_v3  ;;  %v3133_v53 = vmul.f32 %v928_v31, %v736_v25  ;;  %v740_v25 = vmul.f32 0.5, %v3078_v19  ;;  %v741_v38 = vmul.f32 0.5, %v3086_v35 }
 0x13f   : > { %2560 = verf.f32 %v809_v32  ;;  %v810_v63 = vmul.f32 0.70710677, %v3128_v52  ;;  %v3137_v1 = vadd.f32 %v643_v55, %v2965_v48  ;;  %1067 = vadd.xlane.f32.xlu0 %v1066_v9  ;;  %v930_v62 = vadd.f32 1.0, %v2547_v50 }
 0x140   : > { %v2549_v2 = vpop.eup %2548  ;;  %v645_v5 = vpop.f32.mrf.mxu0  ;;  %v3140_v8 = vmul.f32 %v929_v13, %v737_v6  ;;  %v742_v9 = vmul.f32 0.5, %v3095_v51 }
 0x141   : > { %2562 = verf.f32 %v810_v63  ;;  %v811_v14 = vmul.f32 0.70710677, %v3137_v1  ;;  %v3144_v0 = vadd.f32 %v645_v5, %v2962_v46  ;;  %v931_v21 = vadd.f32 1.0, %v2549_v2 }
 0x142   : > { %v2551_v18 = vpop.eup %2550  ;;  %v647_v20 = vpop.f32.mrf.mxu0  ;;  %v1069_v23 = vadd.f32 %v3140_v8, %v3133_v53  ;;  %v3149_v61 = vmul.f32 %v930_v62, %v738_v54 }
 0x143   : > { %2564 = verf.f32 %v811_v14  ;;  %v812_v24 = vmul.f32 0.70710677, %v3144_v0  ;;  %v3153_v3 = vadd.f32 %v647_v20, %v2965_v48  ;;  %v3156_v32 = vmul.f32 %v931_v21, %v739_v4 }
 0x144   : > { %v2553_v6 = vpop.eup %2552  ;;  %1070 = vadd.xlane.f32.xlu1 %v1069_v23  ;;  %v651_v31 = vpop.f32.mrf.mxu0  ;;  %v932_v19 = vadd.f32 1.0, %v2551_v18  ;;  %v743_v14 = vmul.f32 0.5, %v3103_v59 }
 0x145   : > { %2566 = verf.f32 %v812_v24  ;;  %v813_v50 = vmul.f32 0.70710677, %v3153_v3  ;;  %v3160_v54 = vadd.f32 %v651_v31, %v2962_v46  ;;  %v1072_v63 = vadd.f32 %v3156_v32, %v3149_v61 }
 0x146   : > { %v2555_v55 = vpop.eup %2554  ;;  %v653_v13 = vpop.f32.mrf.mxu0  ;;  %v933_v2 = vadd.f32 1.0, %v2553_v6  ;;  %v3165_v35 = vmul.f32 %v932_v19, %v740_v25  ;;  %v744_v24 = vmul.f32 0.5, %v3112_v15 }
 0x147   : > { %2568 = verf.f32 %v813_v50  ;;  %v814_v4 = vmul.f32 0.70710677, %v3160_v54  ;;  %v3169_v5 = vadd.f32 %v653_v13, %v2965_v48  ;;  %1073 = vadd.xlane.f32.xlu0 %v1072_v63  ;;  %v934_v51 = vadd.f32 1.0, %v2555_v55 }
 0x148   : > { %v2557_v62 = vpop.eup %2556  ;;  %v655_v18 = vpop.f32.mrf.mxu0  ;;  %v3172_v20 = vmul.f32 %v933_v2, %v741_v38  ;;  %v745_v13 = vmul.f32 0.5, %v3121_v26 }
 0x149   : > { %2570 = verf.f32 %v814_v4  ;;  %v815_v23 = vmul.f32 0.70710677, %v3169_v5  ;;  %v3176_v25 = vadd.f32 %v655_v18, %v2962_v46  ;;  %v935_v19 = vadd.f32 1.0, %v2557_v62 }
 0x14a   : > { %v2559_v21 = vpop.eup %2558  ;;  %v657_v6 = vpop.f32.mrf.mxu0  ;;  %v1075_v31 = vadd.f32 %v3172_v20, %v3165_v35  ;;  %v3181_v59 = vmul.f32 %v934_v51, %v742_v9  ;;  %v746_v18 = vmul.f32 0.5, %v3128_v52 }
 0x14b   : > { %2572 = verf.f32 %v815_v23  ;;  %v816_v38 = vmul.f32 0.70710677, %v3176_v25  ;;  %v3185_v50 = vadd.f32 %v657_v6, %v2965_v48  ;;  %v3188_v2 = vmul.f32 %v935_v19, %v743_v14 }
 0x14c   : > { %4324 = vst [vmem:[#allocation7_spill] sm:$0xff] %v3181_v59  ;;  %v2561_v55 = vpop.eup %2560  ;;  %1076 = vadd.xlane.f32.xlu1 %v1075_v31  ;;  %v661_v63 = vpop.f32.mrf.mxu0  ;;  %v936_v15 = vadd.f32 1.0, %v2559_v21  ;;  %v747_v19 = vmul.f32 0.5, %v3137_v1 }
 0x14d   : > { %4325 = vst [vmem:[#allocation8_spill] sm:$0xff] %v3188_v2  ;;  %2574 = verf.f32 %v816_v38  ;;  %v817_v4 = vmul.f32 0.70710677, %v3185_v50  ;;  %v3192_v9 = vadd.f32 %v661_v63, %v2962_v46  ;;  %v1078_v23 = vadd.f32 %v3188_v2, %v3181_v59 }
 0x14e   : > { %v2563_v62 = vpop.eup %2562  ;;  %v663_v51 = vpop.f32.mrf.mxu0  ;;  %v937_v6 = vadd.f32 1.0, %v2561_v55  ;;  %v3197_v26 = vmul.f32 %v936_v15, %v744_v24  ;;  %v748_v15 = vmul.f32 0.5, %v3144_v0 }
 0x14f   : > { %2576 = verf.f32 %v817_v4  ;;  %v818_v14 = vmul.f32 0.70710677, %v3192_v9  ;;  %v3201_v21 = vadd.f32 %v663_v51, %v2965_v48  ;;  %1079 = vadd.xlane.f32.xlu0 %v1078_v23  ;;  %v938_v52 = vadd.f32 1.0, %v2563_v62 }
 0x150   : > { %4326 = vst [vmem:[#allocation9_spill] sm:$0xff] %v3197_v26  ;;  %v2565_v31 = vpop.eup %2564  ;;  %v665_v38 = vpop.f32.mrf.mxu0  ;;  %v3204_v63 = vmul.f32 %v937_v6, %v745_v13  ;;  %v749_v6 = vmul.f32 0.5, %v3153_v3 }
 0x151   : > { %2578 = verf.f32 %v818_v14  ;;  %v819_v44 = vmul.f32 0.70710677, %v3201_v21  ;;  %v3208_v24 = vadd.f32 %v665_v38, %v2962_v46  ;;  %v939_v41 = vadd.f32 1.0, %v2565_v31 }
 0x152   : > { %4327 = vst [vmem:[#allocation10_spill] sm:$0xff] %v3204_v63  ;;  %v2567_v55 = vpop.eup %2566  ;;  %v667_v4 = vpop.f32.mrf.mxu0  ;;  %v1081_v51 = vadd.f32 %v3204_v63, %v3197_v26  ;;  %v3213_v1 = vmul.f32 %v938_v52, %v746_v18  ;;  %v750_v31 = vmul.f32 0.5, %v3160_v54 }
 0x153   : > { %2580 = verf.f32 %v819_v44  ;;  %v820_v13 = vmul.f32 0.70710677, %v3208_v24  ;;  %v3217_v62 = vadd.f32 %v667_v4, %v2965_v48  ;;  %v3220_v38 = vmul.f32 %v939_v41, %v747_v19 }
 0x154   : > { %4328 = vst [vmem:[#allocation11_spill] sm:$0xff] %v3213_v1  ;;  %v2569_v23 = vpop.eup %2568  ;;  %1082 = vadd.xlane.f32.xlu1 %v1081_v51  ;;  %v671_v14 = vpop.f32.mrf.mxu0  ;;  %v940_v0 = vadd.f32 1.0, %v2567_v55  ;;  %v751_v51 = vmul.f32 0.5, %v3169_v5 }
 0x155   : > { %4329 = vst [vmem:[#allocation12_spill] sm:$0xff] %v3220_v38  ;;  %2582 = verf.f32 %v820_v13  ;;  %v821_v63 = vmul.f32 0.70710677, %v3217_v62  ;;  %v3224_v18 = vadd.f32 %v671_v14, %v2962_v46  ;;  %v1084_v4 = vadd.f32 %v3220_v38, %v3213_v1 }
 0x156   : > { %v2571_v44 = vpop.eup %2570  ;;  %v673_v52 = vpop.f32.mrf.mxu0  ;;  %v941_v26 = vadd.f32 1.0, %v2569_v23  ;;  %v3229_v3 = vmul.f32 %v940_v0, %v748_v15  ;;  %v752_v23 = vmul.f32 0.5, %v3176_v25 }
 0x157   : > { %2584 = verf.f32 %v821_v63  ;;  %v822_v41 = vmul.f32 0.70710677, %v3224_v18  ;;  %v3233_v19 = vadd.f32 %v673_v52, %v2965_v48  ;;  %1085 = vadd.xlane.f32.xlu0 %v1084_v4  ;;  %v942_v54 = vadd.f32 1.0, %v2571_v44 }
 0x158   : > { %4330 = vst [vmem:[#allocation13_spill] sm:$0xff] %v3229_v3  ;;  %v2573_v55 = vpop.eup %2572  ;;  %v675_v13 = vpop.f32.mrf.mxu0  ;;  %v3236_v14 = vmul.f32 %v941_v26, %v749_v6  ;;  %v753_v4 = vmul.f32 0.5, %v3185_v50 }
 0x159   : > { %2586 = verf.f32 %v822_v41  ;;  %v823_v38 = vmul.f32 0.70710677, %v3233_v19  ;;  %v3240_v15 = vadd.f32 %v675_v13, %v2962_v46  ;;  %v943_v1 = vadd.f32 1.0, %v2573_v55 }
 0x15a   : > { %4331 = vst [vmem:[#allocation14_spill] sm:$0xff] %v3236_v14  ;;  %v2575_v63 = vpop.eup %2574  ;;  %v677_v0 = vpop.f32.mrf.mxu0  ;;  %v1087_v52 = vadd.f32 %v3236_v14, %v3229_v3  ;;  %v3245_v5 = vmul.f32 %v942_v54, %v750_v31  ;;  %v754_v31 = vmul.f32 0.5, %v3192_v9 }
 0x15b   : > { %2588 = verf.f32 %v823_v38  ;;  %v824_v26 = vmul.f32 0.70710677, %v3240_v15  ;;  %v678_v6 = vadd.f32 %v677_v0, %v2965_v48  ;;  %v3250_v13 = vmul.f32 %v943_v1, %v751_v51 }
 0x15c   : > { %4332 = vst [vmem:[#allocation15_spill] sm:$0xff] %v3245_v5  ;;  %v2577_v44 = vpop.eup %2576  ;;  %1088 = vadd.xlane.f32.xlu1 %v1087_v52  ;;  %v681_v41 = vpop.f32.mrf.mxu0  ;;  %v944_v25 = vadd.f32 1.0, %v2575_v63  ;;  %v755_v63 = vmul.f32 0.5, %v3201_v21  ;;  %v757_v21 = vmul.f32 0.5, %v3217_v62  ;;  %v759_v62 = vmul.f32 0.5, %v3233_v19 }
 0x15d   : > { %4333 = vst [vmem:[#allocation16_spill] sm:$0xff] %v3250_v13  ;;  %2590 = verf.f32 %v824_v26  ;;  %v825_v2 = vmul.f32 0.70710677, %v678_v6  ;;  %v682_v14 = vadd.f32 %v681_v41, %v2962_v46  ;;  %v1090_v54 = vadd.f32 %v3250_v13, %v3245_v5 }
 0x15e   : > { %v2579_v55 = vpop.eup %2578  ;;  %v683_v38 = vpop.f32.mrf.mxu0  ;;  %v945_v0 = vadd.f32 1.0, %v2577_v44  ;;  %v3256_v3 = vmul.f32 %v944_v25, %v752_v23  ;;  %v756_v23 = vmul.f32 0.5, %v3208_v24  ;;  %v758_v24 = vmul.f32 0.5, %v3224_v18 }
 0x15f   : > { %2592 = verf.f32 %v825_v2  ;;  %v826_v50 = vmul.f32 0.70710677, %v682_v14  ;;  %v684_v1 = vadd.f32 %v683_v38, %v2965_v48  ;;  %1091 = vadd.xlane.f32.xlu0 %v1090_v54  ;;  %v946_v41 = vadd.f32 1.0, %v2579_v55 }
 0x160   : > { %v2581_v51 = vpop.eup %2580  ;;  %v685_v52 = vpop.f32.mrf.mxu0  ;;  %v3260_v26 = vmul.f32 %v945_v0, %v753_v4 }
 0x161   : > { %2594 = verf.f32 %v826_v50  ;;  %v827_v9 = vmul.f32 0.70710677, %v684_v1  ;;  %v686_v59 = vadd.f32 %v685_v52, %v2962_v46  ;;  %v947_v25 = vadd.f32 1.0, %v2581_v51 }
 0x162   : > { %4334 = vst [vmem:[#allocation17_spill] sm:$0xff] %v3260_v26  ;;  %v2583_v13 = vpop.eup %2582  ;;  %v687_v44 = vpop.f32.mrf.mxu0  ;;  %v1093_v2 = vadd.f32 %v3260_v26, %v3256_v3  ;;  %v3266_v38 = vmul.f32 %v946_v41, %v754_v31 }
 0x163   : > { %2596 = verf.f32 %v827_v9  ;;  %v828_v4 = vmul.f32 0.70710677, %v686_v59  ;;  %v688_v55 = vadd.f32 %v687_v44, %v2965_v48  ;;  %v3270_v0 = vmul.f32 %v947_v25, %v755_v63 }
 0x164   : > { %v2585_v54 = vpop.eup %2584  ;;  %1094 = vadd.xlane.f32.xlu1 %v1093_v2  ;;  %v948_v50 = vadd.f32 1.0, %v2583_v13  ;;  %v760_v13 = vmul.f32 0.5, %v3240_v15 }
 0x165   : > { %2598 = verf.f32 %v828_v4  ;;  %v829_v52 = vmul.f32 0.70710677, %v688_v55  ;;  %v949_v5 = vadd.f32 1.0, %v2585_v54  ;;  %v1096_v31 = vadd.f32 %v3270_v0, %v3266_v38 }
 0x166   : > { %v2587_v26 = vpop.eup %2586  ;;  %v3275_v51 = vmul.f32 %v948_v50, %v756_v23  ;;  %v761_v4 = vmul.f32 0.5, %v678_v6  ;;  %v764_v6 = vmul.f32 0.5, %v686_v59 }
 0x167   : > { %2600 = verf.f32 %v829_v52  ;;  %v3278_v41 = vmul.f32 %v949_v5, %v757_v21  ;;  %v950_v9 = vadd.f32 1.0, %v2587_v26  ;;  %1097 = vadd.xlane.f32.xlu0 %v1096_v31  ;;  %v762_v5 = vmul.f32 0.5, %v682_v14 }
 0x168   : > { %v2589_v63 = vpop.eup %2588  ;;  %v763_v52 = vmul.f32 0.5, %v684_v1 }
 0x169   : > { %v1099_v18 = vadd.f32 %v3278_v41, %v3275_v51  ;;  %v951_v44 = vadd.f32 1.0, %v2589_v63  ;;  %v3283_v2 = vmul.f32 %v950_v9, %v758_v24 }
 0x16a   : > { %v2591_v25 = vpop.eup %2590 }
 0x16b   : > { %4335 = vst [vmem:[#allocation18_spill] sm:$0xff] %v3283_v2  ;;  %1100 = vadd.xlane.f32.xlu1 %v1099_v18  ;;  %v3285_v23 = vmul.f32 %v951_v44, %v759_v62  ;;  %v952_v19 = vadd.f32 1.0, %v2591_v25  ;;  %v765_v44 = vmul.f32 0.5, %v688_v55  ;;  %v2458_v55 = vld [vmem:[%s4267_s5 + $0x74] ss:$8 sps:$4 sm:$0xff]  }
 0x16c   : > { %v2593_v54 = vpop.eup %2592  ;;  %2344 = vmatprep.subr.bf16.mxu1 %v2458_v55  ;;  %1931 = vmatprep.subr.bf16.mxu0 %v2458_v55 }
 0x16d   : > { %4336 = vst [vmem:[#allocation19_spill] sm:$0xff] %v3285_v23  ;;  %v1102_v26 = vadd.f32 %v3285_v23, %v3283_v2  ;;  %v953_v21 = vadd.f32 1.0, %v2593_v54  ;;  %v3289_v50 = vmul.f32 %v952_v19, %v760_v13 }
 0x16e   : > { %v2595_v15 = vpop.eup %2594 }
 0x16f   : > { %4337 = vst [vmem:[#allocation20_spill] sm:$0xff] %v3289_v50  ;;  %1103 = vadd.xlane.f32.xlu0 %v1102_v26  ;;  %v3291_v31 = vmul.f32 %v953_v21, %v761_v4  ;;  %v954_v24 = vadd.f32 1.0, %v2595_v15  ;;  %v2460_v26 = vld [vmem:[%s4267_s5 + $0x70] ss:$8 sps:$4 sm:$0xff]   ;;  %v2461_v21 = vld [vmem:[%s4267_s5 + $0x64] ss:$8 sps:$4 sm:$0xff]   ;;  %v691_v15 = vpop.f32.mrf.mxu0 }
 0x170   : > { %v2597_v9 = vpop.eup %2596  ;;  %2360 = vmatpush1.bf16.msra.mxu1 %v2460_v26  ;;  %1932 = vmatpush1.bf16.msra.mxu0 %v2460_v26 }
 0x171   : > { %4338 = vst [vmem:[#allocation21_spill] sm:$0xff] %v3291_v31  ;;  %v1105_v62 = vadd.f32 %v3291_v31, %v3289_v50  ;;  %v955_v63 = vadd.f32 1.0, %v2597_v9  ;;  %v3295_v18 = vmul.f32 %v954_v24, %v762_v5  ;;  %v3321_v24 = vadd.f32 %v2940_v34, %v2965_v48  ;;  %2345 = vmatprep.subr.bf16.mxu1 %v2461_v21  ;;  %v2464_v9 = vld [vmem:[%s4267_s5 + $0x54] ss:$8 sps:$4 sm:$0xff]  }
 0x172   : > { %v2599_v14 = vpop.eup %2598  ;;  %1933 = vmatprep.subr.bf16.mxu0 %v2461_v21  ;;  %v2472_v21 = vld [vmem:[%s4267_s5 + $0x30] ss:$8 sps:$4 sm:$0xff]  }
 0x173   : > { %4339 = vst [vmem:[#allocation22_spill] sm:$0xff] %v3295_v18  ;;  %1106 = vadd.xlane.f32.xlu1 %v1105_v62  ;;  %v3297_v25 = vmul.f32 %v955_v63, %v763_v52  ;;  %v956_v13 = vadd.f32 1.0, %v2599_v14  ;;  %v2463_v52 = vld [vmem:[%s4267_s5 + $0x60] ss:$8 sps:$4 sm:$0xff]   ;;  %v693_v62 = vpop.f32.mrf.mxu0  ;;  %v2466_v63 = vld [vmem:[%s4267_s5 + $0x50] ss:$8 sps:$4 sm:$0xff]  }
 0x174   : > { %v2601_v19 = vpop.eup %2600  ;;  %2361 = vmatpush1.bf16.msra.mxu1 %v2463_v52  ;;  %1934 = vmatpush1.bf16.msra.mxu0 %v2463_v52  ;;  %v775_v34 = vmul.f32 0.70710677, %v3321_v24  ;;  %v2467_v14 = vld [vmem:[%s4267_s5 + $0x44] ss:$8 sps:$4 sm:$0xff]   ;;  %v711_v50 = vmul.f32 0.5, %v3321_v24 }
 0x175   : > { %4340 = vst [vmem:[#allocation23_spill] sm:$0xff] %v3297_v25  ;;  %v1108_v1 = vadd.f32 %v3297_v25, %v3295_v18  ;;  %v957_v4 = vadd.f32 1.0, %v2601_v19  ;;  %v3301_v54 = vmul.f32 %v956_v13, %v764_v6  ;;  %v3328_v6 = vadd.f32 %v2938_v33, %v2962_v46  ;;  %2346 = vmatprep.subr.bf16.mxu1 %v2464_v9  ;;  %v695_v19 = vpop.f32.mrf.mxu0 }
 0x176   : > { %1935 = vmatprep.subr.bf16.mxu0 %v2464_v9  ;;  %v3340_v33 = vadd.f32 %v2942_v36, %v2962_v46  ;;  %v3344_v13 = vadd.f32 %v2944_v37, %v2965_v48  ;;  %2602 = verf.f32 %v775_v34  ;;  %v3353_v36 = vadd.f32 %v691_v15, %v2962_v46  ;;  %v2473_v15 = vld [vmem:[%s4267_s5 + $0x24] ss:$8 sps:$4 sm:$0xff]  }
 0x177   : > { %4341 = vst [vmem:[#allocation24_spill] sm:$0xff] %v3301_v54  ;;  %1109 = vadd.xlane.f32.xlu0 %v1108_v1  ;;  %v3303_v59 = vmul.f32 %v957_v4, %v765_v44  ;;  %v774_v44 = vmul.f32 0.70710677, %v3328_v6  ;;  %v2469_v1 = vld [vmem:[%s4267_s5 + $0x40] ss:$8 sps:$4 sm:$0xff]   ;;  %v697_v26 = vpop.f32.mrf.mxu0  ;;  %v3368_v9 = vadd.f32 %v695_v19, %v2962_v46  ;;  %v710_v18 = vmul.f32 0.5, %v3328_v6 }
 0x178   : > { %2362 = vmatpush1.bf16.msra.mxu1 %v2466_v63  ;;  %1936 = vmatpush1.bf16.msra.mxu0 %v2466_v63  ;;  %v2470_v4 = vld [vmem:[%s4267_s5 + $0x34] ss:$8 sps:$4 sm:$0xff]   ;;  %v776_v37 = vmul.f32 0.70710677, %v3340_v33  ;;  %v777_v55 = vmul.f32 0.70710677, %v3344_v13  ;;  %v3372_v63 = vadd.f32 %v697_v26, %v2965_v48 }
 0x179   : > { %4342 = vst [vmem:[#allocation25_spill] sm:$0xff] %v3303_v59  ;;  %v1111_v5 = vadd.f32 %v3303_v59, %v3301_v54  ;;  %2347 = vmatprep.subr.bf16.mxu1 %v2467_v14  ;;  %1937 = vmatprep.subr.bf16.mxu0 %v2467_v14  ;;  %2604 = verf.f32 %v774_v44  ;;  %v830_v52 = vmul.f32 0.70710677, %v3353_v36  ;;  %v701_v34 = vpop.f32.mrf.mxu0  ;;  %v2475_v14 = vld [vmem:[%s4267_s5 + $0x20] ss:$8 sps:$4 sm:$0xff]   ;;  %v3379_v44 = vadd.f32 %v2948_v40, %v2965_v48 }
 0x17a   : > { %2606 = verf.f32 %v776_v37  ;;  %v2476_v19 = vld [vmem:[%s4267_s5 + $0x14] ss:$8 sps:$4 sm:$0xff]   ;;  %v833_v37 = vmul.f32 0.70710677, %v3372_v63  ;;  %v3392_v40 = vadd.f32 %v2955_v43, %v2962_v46  ;;  %v2478_v26 = vld [vmem:[%s4267_s5 + $0x10] ss:$8 sps:$4 sm:$0xff]  }
 0x17b   : > { %1112 = vadd.xlane.f32.xlu1 %v1111_v5  ;;  %v3357_v5 = vadd.f32 %v693_v62, %v2965_v48  ;;  %2608 = verf.f32 %v777_v55  ;;  %v703_v55 = vpop.f32.mrf.mxu0 }
 0x17c   : > { %2363 = vmatpush1.bf16.msra.mxu1 %v2469_v1  ;;  %1938 = vmatpush1.bf16.msra.mxu0 %v2469_v1  ;;  %2610 = verf.f32 %v830_v52  ;;  %v832_v1 = vmul.f32 0.70710677, %v3368_v9 }
 0x17d   : > { %2348 = vmatprep.subr.bf16.mxu1 %v2470_v4  ;;  %1939 = vmatprep.subr.bf16.mxu0 %v2470_v4  ;;  %v831_v62 = vmul.f32 0.70710677, %v3357_v5  ;;  %v3387_v4 = vadd.f32 %v2946_v39, %v2962_v46  ;;  %v3400_v39 = vadd.f32 %v2959_v45, %v2965_v48  ;;  %v2481_v45 = vld [vmem:[%s4267_s5] ss:$8 sps:$4 sm:$0xff]  }
 0x17f   : > { %2612 = verf.f32 %v831_v62  ;;  %v778_v52 = vmul.f32 0.70710677, %v3387_v4  ;;  %v705_v62 = vpop.f32.mrf.mxu0  ;;  %v781_v54 = vmul.f32 0.70710677, %v3400_v39 }
 0x180   : > { %2364 = vmatpush1.bf16.msra.mxu1 %v2472_v21  ;;  %1940 = vmatpush1.bf16.msra.mxu0 %v2472_v21  ;;  %v779_v21 = vmul.f32 0.70710677, %v3379_v44  ;;  %2614 = verf.f32 %v832_v1 }
 0x181   : > { %2349 = vmatprep.subr.bf16.mxu1 %v2473_v15  ;;  %1941 = vmatprep.subr.bf16.mxu0 %v2473_v15  ;;  %v2479_v15 = vld [vmem:[%s4267_s5 + $0x4] ss:$8 sps:$4 sm:$0xff]   ;;  %2616 = verf.f32 %v833_v37  ;;  %v2482_v37 = vld [vmem:[%s4267_s5 + $0xf4] ss:$8 sps:$4 sm:$0xff]  }
 0x182   : > { %2618 = verf.f32 %v779_v21  ;;  %v707_v21 = vpop.f32.mrf.mxu0 }
 0x183   : > { %v2603_v43 = vpop.eup %2602  ;;  %2620 = verf.f32 %v778_v52 }
 0x184   : > { %2365 = vmatpush1.bf16.msra.mxu1 %v2475_v14  ;;  %1942 = vmatpush1.bf16.msra.mxu0 %v2475_v14  ;;  %v780_v14 = vmul.f32 0.70710677, %v3392_v40  ;;  %v903_v25 = vadd.f32 1.0, %v2603_v43  ;;  %v712_v43 = vmul.f32 0.5, %v3340_v33 }
 0x185   : > { %2350 = vmatprep.subr.bf16.mxu1 %v2476_v19  ;;  %1943 = vmatprep.subr.bf16.mxu0 %v2476_v19  ;;  %v3412_v19 = vadd.f32 %v701_v34, %v2962_v46 }
 0x186   : > { %v2605_v59 = vpop.eup %2604  ;;  %2622 = verf.f32 %v780_v14  ;;  %v3433_v52 = vmul.f32 %v903_v25, %v711_v50  ;;  %v713_v14 = vmul.f32 0.5, %v3344_v13 }
 0x187   : > { %v902_v34 = vadd.f32 1.0, %v2605_v59  ;;  %v2607_v23 = vpop.eup %2606  ;;  %2624 = verf.f32 %v781_v54  ;;  %v834_v24 = vmul.f32 0.70710677, %v3412_v19 }
 0x188   : > { %2366 = vmatpush1.bf16.msra.mxu1 %v2478_v26  ;;  %1944 = vmatpush1.bf16.msra.mxu0 %v2478_v26  ;;  %v3420_v26 = vadd.f32 %v703_v55, %v2965_v48  ;;  %v2609_v6 = vpop.eup %2608  ;;  %v3431_v55 = vadd.f32 %v705_v62, %v2962_v46  ;;  %v904_v50 = vadd.f32 1.0, %v2607_v23 }
 0x189   : > { %2351 = vmatprep.subr.bf16.mxu1 %v2479_v15  ;;  %1945 = vmatprep.subr.bf16.mxu0 %v2479_v15  ;;  %v2611_v54 = vpop.eup %2610  ;;  %v3444_v62 = vmul.f32 %v902_v34, %v710_v18  ;;  %2626 = verf.f32 %v834_v24 }
 0x18a   : > { %v835_v46 = vmul.f32 0.70710677, %v3420_v26  ;;  %v958_v24 = vadd.f32 1.0, %v2611_v54 }
 0x18b   : > { %v1030_v18 = vadd.f32 %v3433_v52, %v3444_v62 }
 0x18c   : > { %2367 = vmatpush1.bf16.msra.mxu1 %v2481_v45  ;;  %1946 = vmatpush1.bf16.msra.mxu0 %v2481_v45  ;;  %v2613_v25 = vpop.eup %2612  ;;  %2628 = verf.f32 %v835_v46 }
 0x18d   : > { %2352 = vmatprep.subr.bf16.mxu1 %v2482_v37  ;;  %1947 = vmatprep.subr.bf16.mxu0 %v2482_v37  ;;  %v905_v37 = vadd.f32 1.0, %v2609_v6  ;;  %v2615_v6 = vpop.eup %2614 }
 0x1a8   : > { %v1044_v1 = vpop.xlane.xlu0 %1043 }
 0x1a9   : > { %v1131_v31 = vmul.f32 0.00390625, %v1044_v1 }
 0x1ab   : > { %v3424_v2 = vsub.f32 %v2996_v28, %v1131_v31  ;;  %v3427_v15 = vsub.f32 %v2998_v29, %v1131_v31  ;;  %v3436_v28 = vadd.f32 %v707_v21, %v2965_v48  ;;  %v766_v21 = vmul.f32 0.5, %v3353_v36 }
 0x1ac   : > { %v767_v36 = vmul.f32 0.5, %v3357_v5  ;;  %v3472_v5 = vmul.f32 %v904_v50, %v712_v43 }
 0x1ad   : > { %4343 = vst [vmem:[#allocation26_spill] sm:$0xff] %v3424_v2  ;;  %4344 = vst [vmem:[#allocation27_spill] sm:$0xff] %v3427_v15  ;;  %v1047_v59 = vpop.xlane.xlu0 %1046  ;;  %v1231_v29 = vmul.f32 %v3424_v2, %v3424_v2  ;;  %v1232_v31 = vmul.f32 %v3427_v15, %v3427_v15  ;;  %v837_v23 = vmul.f32 0.70710677, %v3436_v28 }
 0x1ae   : > { %v1132_v33 = vmul.f32 0.00390625, %v1047_v59  ;;  %v836_v59 = vmul.f32 0.70710677, %v3431_v55 }
 0x1af   : > { %v1299_v1 = vadd.f32 %v1232_v31, %v1231_v29  ;;  %v2617_v29 = vpop.eup %2616 }
 0x1b0   : > { %v3447_v45 = vsub.f32 %v3010_v56, %v1132_v33  ;;  %v3450_v48 = vsub.f32 %v3012_v57, %v1132_v33  ;;  %v1050_v13 = vpop.xlane.xlu1 %1049  ;;  %v959_v33 = vadd.f32 1.0, %v2613_v25  ;;  %2630 = verf.f32 %v836_v59  ;;  %v2619_v54 = vpop.eup %2618 }
 0x1b1   : > { %v1133_v34 = vmul.f32 0.00390625, %v1050_v13  ;;  %1300 = vadd.xlane.f32.xlu0 %v1299_v1  ;;  %v3468_v13 = vmul.f32 %v905_v37, %v713_v14  ;;  %2632 = verf.f32 %v837_v23  ;;  %v3478_v14 = vmul.f32 %v958_v24, %v766_v21  ;;  %v2621_v37 = vpop.eup %2620 }
 0x1b2   : > { %4345 = vst [vmem:[#allocation28_spill] sm:$0xff] %v3447_v45  ;;  %4346 = vst [vmem:[#allocation29_spill] sm:$0xff] %v3450_v48  ;;  %v1233_v56 = vmul.f32 %v3447_v45, %v3447_v45  ;;  %v1234_v57 = vmul.f32 %v3450_v48, %v3450_v48  ;;  %v768_v45 = vmul.f32 0.5, %v3368_v9  ;;  %v769_v48 = vmul.f32 0.5, %v3372_v63 }
 0x1b3   : > { %v3463_v31 = vsub.f32 %v3024_v11, %v1133_v34  ;;  %v3466_v2 = vsub.f32 %v3026_v12, %v1133_v34  ;;  %v3480_v9 = vmul.f32 %v959_v33, %v767_v36  ;;  %v960_v63 = vadd.f32 1.0, %v2615_v6  ;;  %v2484_v6 = vld [vmem:[%s4267_s5 + $0xf0] ss:$8 sps:$4 sm:$0xff]  }
 0x1b4   : > { %v1302_v1 = vadd.f32 %v1234_v57, %v1233_v56  ;;  %v961_v25 = vadd.f32 1.0, %v2617_v29  ;;  %v1033_v50 = vadd.f32 %v3468_v13, %v3472_v5  ;;  %v907_v34 = vadd.f32 1.0, %v2619_v54  ;;  %2368 = vmatpush2.bf16.msra.mxu1 %v2484_v6  ;;  %1948 = vmatpush2.bf16.msra.mxu0 %v2484_v6  ;;  %v2488_v6 = vld [vmem:[%s4267_s5 + $0xd4] ss:$8 sps:$4 sm:$0xff]  }
 0x1b5   : > { %v1053_v15 = vpop.xlane.xlu1 %1052  ;;  %1031 = vadd.xlane.f32.xlu0 %v1030_v18  ;;  %v1235_v11 = vmul.f32 %v3463_v31, %v3463_v31  ;;  %v1236_v12 = vmul.f32 %v3466_v2, %v3466_v2  ;;  %v2623_v18 = vpop.eup %2622  ;;  %v715_v56 = vmul.f32 0.5, %v3379_v44  ;;  %v1114_v36 = vadd.f32 %v3480_v9, %v3478_v14 }
 0x1b6   : > { %v1134_v46 = vmul.f32 0.00390625, %v1053_v15  ;;  %1303 = vadd.xlane.f32.xlu1 %v1302_v1  ;;  %v2625_v21 = vpop.eup %2624  ;;  %v3500_v24 = vmul.f32 %v960_v63, %v768_v45  ;;  %v3502_v33 = vmul.f32 %v961_v25, %v769_v48  ;;  %v906_v44 = vadd.f32 1.0, %v2621_v37  ;;  %v2485_v45 = vld [vmem:[%s4267_s5 + $0xe4] ss:$8 sps:$4 sm:$0xff]  }
 0x1b7   : > { %v1305_v59 = vadd.f32 %v1236_v12, %v1235_v11  ;;  %v3511_v12 = vmul.f32 %v907_v34, %v715_v56  ;;  %v2627_v48 = vpop.eup %2626  ;;  %v908_v25 = vadd.f32 1.0, %v2623_v18  ;;  %v717_v37 = vmul.f32 0.5, %v3400_v39  ;;  %2353 = vmatprep.subr.bf16.mxu1 %v2485_v45  ;;  %1949 = vmatprep.subr.bf16.mxu0 %v2485_v45 }
 0x1b8   : > { %v3483_v43 = vsub.f32 %v3040_v27, %v1134_v46  ;;  %v3486_v15 = vsub.f32 %v3042_v30, %v1134_v46  ;;  %v1056_v23 = vpop.xlane.xlu0 %1055  ;;  %v714_v46 = vmul.f32 0.5, %v3387_v4  ;;  %v2487_v4 = vld [vmem:[%s4267_s5 + $0xe0] ss:$8 sps:$4 sm:$0xff]   ;;  %v2629_v34 = vpop.eup %2628  ;;  %v962_v45 = vadd.f32 1.0, %v2627_v48 }
 0x1b9   : > { %v1135_v57 = vmul.f32 0.00390625, %v1056_v23  ;;  %1306 = vadd.xlane.f32.xlu0 %v1305_v59  ;;  %v1117_v59 = vadd.f32 %v3502_v33, %v3500_v24  ;;  %2369 = vmatpush2.bf16.msra.mxu1 %v2487_v4  ;;  %v773_v48 = vmul.f32 0.5, %v3436_v28 }
 0x1ba   : > { %1034 = vadd.xlane.f32.xlu1 %v1033_v50  ;;  %v1237_v27 = vmul.f32 %v3483_v43, %v3483_v43  ;;  %v1238_v30 = vmul.f32 %v3486_v15, %v3486_v15  ;;  %v909_v50 = vadd.f32 1.0, %v2625_v21  ;;  %v3526_v23 = vmul.f32 %v906_v44, %v714_v46  ;;  %1950 = vmatpush2.bf16.msra.mxu0 %v2487_v4 }
 0x1bb   : > { %v3505_v29 = vsub.f32 %v3056_v58, %v1135_v57  ;;  %v3508_v1 = vsub.f32 %v3058_v60, %v1135_v57  ;;  %v716_v21 = vmul.f32 0.5, %v3392_v40  ;;  %2354 = vmatprep.subr.bf16.mxu1 %v2488_v6  ;;  %1951 = vmatprep.subr.bf16.mxu0 %v2488_v6  ;;  %v772_v4 = vmul.f32 0.5, %v3431_v55  ;;  %v2493_v55 = vld [vmem:[%s4267_s5 + $0xc0] ss:$8 sps:$4 sm:$0xff]  }
 0x1bc   : > { %v1308_v54 = vadd.f32 %v1238_v30, %v1237_v27  ;;  %v1036_v27 = vadd.f32 %v3511_v12, %v3526_v23  ;;  %v3537_v30 = vmul.f32 %v909_v50, %v717_v37  ;;  %v771_v50 = vmul.f32 0.5, %v3420_v26  ;;  %v2491_v26 = vld [vmem:[%s4267_s5 + $0xc4] ss:$8 sps:$4 sm:$0xff]  }
 0x1bd   : > { %v1059_v11 = vpop.xlane.xlu1 %1058  ;;  %1115 = vadd.xlane.f32.xlu0 %v1114_v36  ;;  %v1239_v58 = vmul.f32 %v3505_v29, %v3505_v29  ;;  %v1240_v60 = vmul.f32 %v3508_v1, %v3508_v1  ;;  %v2631_v40 = vpop.eup %2630  ;;  %v3546_v44 = vmul.f32 %v908_v25, %v716_v21 }
 0x1be   : > { %v1136_v63 = vmul.f32 0.00390625, %v1059_v11  ;;  %1309 = vadd.xlane.f32.xlu1 %v1308_v54  ;;  %v2490_v54 = vld [vmem:[%s4267_s5 + $0xd0] ss:$8 sps:$4 sm:$0xff]   ;;  %v2633_v46 = vpop.eup %2632  ;;  %v770_v11 = vmul.f32 0.5, %v3412_v19 }
 0x1bf   : > { %v1311_v57 = vadd.f32 %v1240_v60, %v1239_v58  ;;  %2370 = vmatpush2.bf16.msra.mxu1 %v2490_v54  ;;  %1952 = vmatpush2.bf16.msra.mxu0 %v2490_v54  ;;  %v1039_v19 = vadd.f32 %v3537_v30, %v3546_v44 }
 0x1c0   : > { %v3530_v56 = vsub.f32 %v3072_v16, %v1136_v63  ;;  %v3533_v18 = vsub.f32 %v3074_v17, %v1136_v63  ;;  %v1062_v39 = vpop.xlane.xlu0 %1061  ;;  %v963_v63 = vadd.f32 1.0, %v2629_v34  ;;  %v3573_v34 = vmul.f32 %v962_v45, %v770_v11  ;;  %2355 = vmatprep.subr.bf16.mxu1 %v2491_v26  ;;  %1953 = vmatprep.subr.bf16.mxu0 %v2491_v26  ;;  %v2496_v11 = vld [vmem:[%s4267_s5 + $0xb0] ss:$8 sps:$4 sm:$0xff]   ;;  %v2499_v26 = vld [vmem:[%s4267_s5 + $0xa0] ss:$8 sps:$4 sm:$0xff]  }
 0x1c1   : > { %v1137_v36 = vmul.f32 0.00390625, %v1062_v39  ;;  %1312 = vadd.xlane.f32.xlu0 %v1311_v57  ;;  %v964_v57 = vadd.f32 1.0, %v2631_v40  ;;  %v965_v39 = vadd.f32 1.0, %v2633_v46 }
 0x1c2   : > { %1118 = vadd.xlane.f32.xlu1 %v1117_v59  ;;  %v1241_v16 = vmul.f32 %v3530_v56, %v3530_v56  ;;  %v1242_v17 = vmul.f32 %v3533_v18, %v3533_v18  ;;  %v3575_v21 = vmul.f32 %v963_v63, %v771_v50 }
 0x1c3   : > { %v3554_v58 = vsub.f32 %v3088_v47, %v1137_v36  ;;  %v3557_v60 = vsub.f32 %v3090_v49, %v1137_v36  ;;  %2371 = vmatpush2.bf16.msra.mxu1 %v2493_v55  ;;  %1954 = vmatpush2.bf16.msra.mxu0 %v2493_v55  ;;  %v3592_v54 = vmul.f32 %v964_v57, %v772_v4 }
 0x1c4   : > { %v1314_v25 = vadd.f32 %v1242_v17, %v1241_v16  ;;  %v3594_v46 = vmul.f32 %v965_v39, %v773_v48 }
 0x1c5   : > { %v1065_v37 = vpop.xlane.xlu1 %1064  ;;  %1037 = vadd.xlane.f32.xlu0 %v1036_v27  ;;  %v1243_v49 = vmul.f32 %v3554_v58, %v3554_v58  ;;  %v1244_v59 = vmul.f32 %v3557_v60, %v3557_v60 }
 0x1c6   : > { %v1138_v47 = vmul.f32 0.00390625, %v1065_v37  ;;  %1315 = vadd.xlane.f32.xlu1 %v1314_v25 }
 0x1c7   : > { %v1317_v6 = vadd.f32 %v1244_v59, %v1243_v49 }
 0x1c8   : > { %v3578_v28 = vsub.f32 %v3106_v10, %v1138_v47  ;;  %v3581_v27 = vsub.f32 %v3108_v7, %v1138_v47  ;;  %v1068_v36 = vpop.xlane.xlu0 %1067  ;;  %v2494_v10 = vld [vmem:[%s4267_s5 + $0xb4] ss:$8 sps:$4 sm:$0xff]   ;;  %v1120_v7 = vadd.f32 %v3575_v21, %v3573_v34 }
 0x1c9   : > { %v1139_v16 = vmul.f32 0.00390625, %v1068_v36  ;;  %1318 = vadd.xlane.f32.xlu0 %v1317_v6  ;;  %2356 = vmatprep.subr.bf16.mxu1 %v2494_v10 }
 0x1ca   : > { %1040 = vadd.xlane.f32.xlu1 %v1039_v19  ;;  %v1245_v17 = vmul.f32 %v3578_v28, %v3578_v28  ;;  %v1246_v40 = vmul.f32 %v3581_v27, %v3581_v27  ;;  %1955 = vmatprep.subr.bf16.mxu0 %v2494_v10 }
 0x1cb   : > { %v3600_v50 = vsub.f32 %v3117_v22, %v1139_v16  ;;  %v3603_v45 = vsub.f32 %v3124_v42, %v1139_v16  ;;  %2372 = vmatpush2.bf16.msra.mxu1 %v2496_v11  ;;  %1956 = vmatpush2.bf16.msra.mxu0 %v2496_v11  ;;  %v2497_v22 = vld [vmem:[%s4267_s5 + $0xa4] ss:$8 sps:$4 sm:$0xff]   ;;  %v1123_v42 = vadd.f32 %v3594_v46, %v3592_v54 }
 0x1cc   : > { %v1320_v63 = vadd.f32 %v1246_v40, %v1245_v17  ;;  %2357 = vmatprep.subr.bf16.mxu1 %v2497_v22  ;;  %1957 = vmatprep.subr.bf16.mxu0 %v2497_v22 }
 0x1cd   : > { %v1071_v25 = vpop.xlane.xlu1 %1070  ;;  %1121 = vadd.xlane.f32.xlu0 %v1120_v7  ;;  %v1247_v37 = vmul.f32 %v3600_v50, %v3600_v50  ;;  %v1248_v19 = vmul.f32 %v3603_v45, %v3603_v45 }
 0x1ce   : > { %v1140_v4 = vmul.f32 0.00390625, %v1071_v25  ;;  %1321 = vadd.xlane.f32.xlu1 %v1320_v63 }
 0x1cf   : > { %v1323_v49 = vadd.f32 %v1248_v19, %v1247_v37  ;;  %2373 = vmatpush2.bf16.msra.mxu1 %v2499_v26  ;;  %1958 = vmatpush2.bf16.msra.mxu0 %v2499_v26  ;;  %v4348_v26 = vld [vmem:[#allocation8_spill] sm:$0xff] }
 0x1d0   : > { %v3618_v48 = vsub.f32 %v3133_v53, %v1140_v4  ;;  %v3621_v47 = vsub.f32 %v3140_v8, %v1140_v4  ;;  %v1074_v59 = vpop.xlane.xlu0 %1073  ;;  %v2500_v53 = vld [vmem:[%s4267_s5 + $0x94] ss:$8 sps:$4 sm:$0xff]   ;;  %v2502_v8 = vld [vmem:[%s4267_s5 + $0x90] ss:$8 sps:$4 sm:$0xff]  }
 0x1d1   : > { %v1141_v55 = vmul.f32 0.00390625, %v1074_v59  ;;  %1324 = vadd.xlane.f32.xlu0 %v1323_v49  ;;  %2358 = vmatprep.subr.bf16.mxu1 %v2500_v53 }
 0x1d2   : > { %1124 = vadd.xlane.f32.xlu1 %v1123_v42  ;;  %v1249_v57 = vmul.f32 %v3618_v48, %v3618_v48  ;;  %v1250_v39 = vmul.f32 %v3621_v47, %v3621_v47  ;;  %1959 = vmatprep.subr.bf16.mxu0 %v2500_v53  ;;  %v4347_v42 = vld [vmem:[#allocation7_spill] sm:$0xff]  ;;  %v4349_v53 = vld [vmem:[#allocation9_spill] sm:$0xff] }
 0x1d3   : > { %v3634_v6 = vsub.f32 %v3149_v61, %v1141_v55  ;;  %v3637_v36 = vsub.f32 %v3156_v32, %v1141_v55  ;;  %2374 = vmatpush2.bf16.msra.mxu1 %v2502_v8  ;;  %1960 = vmatpush2.bf16.msra.mxu0 %v2502_v8  ;;  %v2503_v61 = vld [vmem:[%s4267_s5 + $0x84] ss:$8 sps:$4 sm:$0xff]   ;;  %v2505_v32 = vld [vmem:[%s4267_s5 + $0x80] ss:$8 sps:$4 sm:$0xff]  }
 0x1d4   : > { %v1326_v16 = vadd.f32 %v1250_v39, %v1249_v57  ;;  %2359 = vmatprep.subr.bf16.mxu1 %v2503_v61  ;;  %1961 = vmatprep.subr.bf16.mxu0 %v2503_v61 }
 0x1d5   : > { %v1077_v17 = vpop.xlane.xlu1 %1076  ;;  %v1251_v10 = vmul.f32 %v3634_v6, %v3634_v6  ;;  %v1252_v7 = vmul.f32 %v3637_v36, %v3637_v36 }
 0x1d6   : > { %v1142_v40 = vmul.f32 0.00390625, %v1077_v17  ;;  %1327 = vadd.xlane.f32.xlu1 %v1326_v16  ;;  %v4350_v16 = vld [vmem:[#allocation10_spill] sm:$0xff] }
 0x1d7   : > { %v1329_v25 = vadd.f32 %v1252_v7, %v1251_v10  ;;  %2375 = vmatpush2.bf16.msra.mxu1 %v2505_v32  ;;  %1962 = vmatpush2.bf16.msra.mxu0 %v2505_v32 }
 0x1d8   : > { %v3650_v11 = vsub.f32 %v3165_v35, %v1142_v40  ;;  %v3653_v63 = vsub.f32 %v3172_v20, %v1142_v40  ;;  %v1080_v4 = vpop.xlane.xlu0 %1079 }
 0x1d9   : > { %v1143_v37 = vmul.f32 0.00390625, %v1080_v4  ;;  %1330 = vadd.xlane.f32.xlu0 %v1329_v25  ;;  %v4351_v25 = vld [vmem:[#allocation11_spill] sm:$0xff] }
 0x1da   : > { %v1253_v19 = vmul.f32 %v3650_v11, %v3650_v11  ;;  %v1254_v22 = vmul.f32 %v3653_v63, %v3653_v63 }
 0x1db   : > { %v3660_v35 = vsub.f32 %v4347_v42, %v1143_v37  ;;  %v3663_v20 = vsub.f32 %v4348_v26, %v1143_v37  ;;  %v4352_v37 = vld [vmem:[#allocation12_spill] sm:$0xff] }
 0x1dc   : > { %v1332_v49 = vadd.f32 %v1254_v22, %v1253_v19 }
 0x1dd   : > { %v1083_v59 = vpop.xlane.xlu1 %1082  ;;  %v1255_v57 = vmul.f32 %v3660_v35, %v3660_v35  ;;  %v1256_v39 = vmul.f32 %v3663_v20, %v3663_v20 }
 0x1de   : > { %v1144_v55 = vmul.f32 0.00390625, %v1083_v59  ;;  %1333 = vadd.xlane.f32.xlu1 %v1332_v49 }
 0x1df   : > { %v1335_v40 = vadd.f32 %v1256_v39, %v1255_v57  ;;  %v4355_v39 = vld [vmem:[#allocation14_spill] sm:$0xff] }
 0x1e0   : > { %v3670_v8 = vsub.f32 %v4349_v53, %v1144_v55  ;;  %v3673_v17 = vsub.f32 %v4350_v16, %v1144_v55  ;;  %v1086_v10 = vpop.xlane.xlu0 %1085  ;;  %v4353_v55 = vld [vmem:[#allocation13_spill] sm:$0xff] }
 0x1e1   : > { %v1145_v7 = vmul.f32 0.00390625, %v1086_v10  ;;  %1336 = vadd.xlane.f32.xlu0 %v1335_v40 }
 0x1e2   : > { %v1257_v61 = vmul.f32 %v3670_v8, %v3670_v8  ;;  %v1258_v32 = vmul.f32 %v3673_v17, %v3673_v17 }
 0x1e3   : > { %v3680_v4 = vsub.f32 %v4351_v25, %v1145_v7  ;;  %v3683_v19 = vsub.f32 %v4352_v37, %v1145_v7  ;;  %v4357_v37 = vld [vmem:[#allocation16_spill] sm:$0xff] }
 0x1e4   : > { %v1338_v22 = vadd.f32 %v1258_v32, %v1257_v61  ;;  %v4356_v32 = vld [vmem:[#allocation15_spill] sm:$0xff] }
 0x1e5   : > { %v1089_v42 = vpop.xlane.xlu1 %1088  ;;  %v1259_v49 = vmul.f32 %v3680_v4, %v3680_v4  ;;  %v1260_v59 = vmul.f32 %v3683_v19, %v3683_v19 }
 0x1e6   : > { %v1146_v26 = vmul.f32 0.00390625, %v1089_v42  ;;  %1339 = vadd.xlane.f32.xlu1 %v1338_v22 }
 0x1e7   : > { %v1341_v16 = vadd.f32 %v1260_v59, %v1259_v49 }
 0x1e8   : > { %v3690_v57 = vsub.f32 %v4353_v55, %v1146_v26  ;;  %v3693_v53 = vsub.f32 %v4355_v39, %v1146_v26  ;;  %v1092_v40 = vpop.xlane.xlu0 %1091 }
 0x1e9   : > { %v1147_v10 = vmul.f32 0.00390625, %v1092_v40  ;;  %1342 = vadd.xlane.f32.xlu0 %v1341_v16  ;;  %v4359_v16 = vld [vmem:[#allocation17_spill] sm:$0xff] }
 0x1ea   : > { %4354 = vst [vmem:[#allocation7_spill] sm:$0xff] %v3690_v57  ;;  %v1261_v7 = vmul.f32 %v3690_v57, %v3690_v57  ;;  %v1262_v61 = vmul.f32 %v3693_v53, %v3693_v53 }
 0x1eb   : > { %v3700_v25 = vsub.f32 %v4356_v32, %v1147_v10  ;;  %v3703_v22 = vsub.f32 %v4357_v37, %v1147_v10 }
 0x1ec   : > { %v1344_v42 = vadd.f32 %v1262_v61, %v1261_v7 }
 0x1ed   : > { %v1095_v55 = vpop.xlane.xlu1 %1094  ;;  %v1263_v49 = vmul.f32 %v3700_v25, %v3700_v25  ;;  %v1264_v59 = vmul.f32 %v3703_v22, %v3703_v22 }
 0x1ee   : > { %v1148_v26 = vmul.f32 0.00390625, %v1095_v55  ;;  %1345 = vadd.xlane.f32.xlu1 %v1344_v42 }
 0x1ef   : > { %v1347_v32 = vadd.f32 %v1264_v59, %v1263_v49 }
 0x1f0   : > { %v3710_v39 = vsub.f32 %v3256_v3, %v1148_v26  ;;  %v3713_v40 = vsub.f32 %v4359_v16, %v1148_v26  ;;  %v1098_v57 = vpop.xlane.xlu0 %1097 }
 0x1f1   : > { %v1149_v10 = vmul.f32 0.00390625, %v1098_v57  ;;  %1348 = vadd.xlane.f32.xlu0 %v1347_v32 }
 0x1f2   : > { %4358 = vst [vmem:[#allocation8_spill] sm:$0xff] %v3710_v39  ;;  %v1265_v7 = vmul.f32 %v3710_v39, %v3710_v39  ;;  %v1266_v61 = vmul.f32 %v3713_v40, %v3713_v40 }
 0x1f3   : > { %v3720_v37 = vsub.f32 %v3266_v38, %v1149_v10  ;;  %v3723_v42 = vsub.f32 %v3270_v0, %v1149_v10 }
 0x1f4   : > { %v1101_v3 = vpop.xlane.xlu1 %1100  ;;  %v1350_v55 = vadd.f32 %v1266_v61, %v1265_v7  ;;  %v4364_v61 = vld [vmem:[#allocation18_spill] sm:$0xff] }
 0x1f5   : > { %4360 = vst [vmem:[#allocation9_spill] sm:$0xff] %v3720_v37  ;;  %4361 = vst [vmem:[#allocation10_spill] sm:$0xff] %v3723_v42  ;;  %v1150_v26 = vmul.f32 0.00390625, %v1101_v3  ;;  %v1267_v57 = vmul.f32 %v3720_v37, %v3720_v37  ;;  %v1268_v49 = vmul.f32 %v3723_v42, %v3723_v42 }
 0x1f6   : > { %1351 = vadd.xlane.f32.xlu1 %v1350_v55  ;;  %v4366_v55 = vld [vmem:[#allocation19_spill] sm:$0xff] }
 0x1f7   : > { %v3730_v59 = vsub.f32 %v3275_v51, %v1150_v26  ;;  %v3733_v16 = vsub.f32 %v3278_v41, %v1150_v26  ;;  %v1353_v32 = vadd.f32 %v1268_v49, %v1267_v57  ;;  %v4368_v49 = vld [vmem:[#allocation20_spill] sm:$0xff] }
 0x1f8   : > { %v1104_v38 = vpop.xlane.xlu0 %1103 }
 0x1f9   : > { %4362 = vst [vmem:[#allocation11_spill] sm:$0xff] %v3730_v59  ;;  %4363 = vst [vmem:[#allocation12_spill] sm:$0xff] %v3733_v16  ;;  %v1151_v0 = vmul.f32 0.00390625, %v1104_v38  ;;  %v1269_v10 = vmul.f32 %v3730_v59, %v3730_v59  ;;  %v1270_v7 = vmul.f32 %v3733_v16, %v3733_v16  ;;  %1354 = vadd.xlane.f32.xlu0 %v1353_v32  ;;  %v4370_v32 = vld [vmem:[#allocation21_spill] sm:$0xff] }
 0x1fb   : > { %v3740_v3 = vsub.f32 %v4364_v61, %v1151_v0  ;;  %v3743_v37 = vsub.f32 %v4366_v55, %v1151_v0  ;;  %v1356_v51 = vadd.f32 %v1270_v7, %v1269_v10  ;;  %v4372_v7 = vld [vmem:[#allocation22_spill] sm:$0xff] }
 0x1fc   : > { %v1107_v42 = vpop.xlane.xlu1 %1106 }
 0x1fd   : > { %4365 = vst [vmem:[#allocation13_spill] sm:$0xff] %v3740_v3  ;;  %4367 = vst [vmem:[#allocation14_spill] sm:$0xff] %v3743_v37  ;;  %v1152_v41 = vmul.f32 0.00390625, %v1107_v42  ;;  %1357 = vadd.xlane.f32.xlu1 %v1356_v51  ;;  %v1271_v26 = vmul.f32 %v3740_v3, %v3740_v3  ;;  %v1272_v57 = vmul.f32 %v3743_v37, %v3743_v37  ;;  %v4374_v51 = vld [vmem:[#allocation23_spill] sm:$0xff] }
 0x1ff   : > { %v3750_v38 = vsub.f32 %v4368_v49, %v1152_v41  ;;  %v3753_v59 = vsub.f32 %v4370_v32, %v1152_v41  ;;  %v1359_v61 = vadd.f32 %v1272_v57, %v1271_v26  ;;  %v4376_v57 = vld [vmem:[#allocation24_spill] sm:$0xff] }
 0x200   : > { %v1110_v16 = vpop.xlane.xlu0 %1109 }
 0x201   : > { %4369 = vst [vmem:[#allocation15_spill] sm:$0xff] %v3750_v38  ;;  %4371 = vst [vmem:[#allocation16_spill] sm:$0xff] %v3753_v59  ;;  %v1153_v0 = vmul.f32 0.00390625, %v1110_v16  ;;  %1360 = vadd.xlane.f32.xlu0 %v1359_v61  ;;  %v1273_v42 = vmul.f32 %v3750_v38, %v3750_v38  ;;  %v1274_v10 = vmul.f32 %v3753_v59, %v3753_v59  ;;  %v4378_v61 = vld [vmem:[#allocation25_spill] sm:$0xff] }
 0x203   : > { %v3760_v55 = vsub.f32 %v4372_v7, %v1153_v0  ;;  %v3763_v3 = vsub.f32 %v4374_v51, %v1153_v0  ;;  %v1362_v49 = vadd.f32 %v1274_v10, %v1273_v42 }
 0x204   : > { %v1113_v37 = vpop.xlane.xlu1 %1112 }
 0x205   : > { %4373 = vst [vmem:[#allocation17_spill] sm:$0xff] %v3760_v55  ;;  %4375 = vst [vmem:[#allocation18_spill] sm:$0xff] %v3763_v3  ;;  %v1154_v41 = vmul.f32 0.00390625, %v1113_v37  ;;  %1363 = vadd.xlane.f32.xlu1 %v1362_v49  ;;  %v1275_v16 = vmul.f32 %v3760_v55, %v3760_v55  ;;  %v1276_v26 = vmul.f32 %v3763_v3, %v3763_v3 }
 0x207   : > { %v3770_v32 = vsub.f32 %v4376_v57, %v1154_v41  ;;  %v3773_v38 = vsub.f32 %v4378_v61, %v1154_v41  ;;  %v1365_v7 = vadd.f32 %v1276_v26, %v1275_v16 }
 0x209   : > { %4377 = vst [vmem:[#allocation19_spill] sm:$0xff] %v3770_v32  ;;  %4379 = vst [vmem:[#allocation20_spill] sm:$0xff] %v3773_v38  ;;  %1366 = vadd.xlane.f32.xlu0 %v1365_v7  ;;  %v1277_v0 = vmul.f32 %v3770_v32, %v3770_v32  ;;  %v1278_v37 = vmul.f32 %v3773_v38, %v3773_v38 }
 0x20b   : > { %v1368_v42 = vadd.f32 %v1278_v37, %v1277_v0 }
 0x20d   : > { %1369 = vadd.xlane.f32.xlu1 %v1368_v42 }
 0x23a   : > { %v1301_v10 = vpop.xlane.xlu0 %1300 }
 0x23b   : > { %v1387_v51 = vmul.f32 0.00390625, %v1301_v10 }
 0x23d   : > { %v1419_v49 = vadd.f32 1e-06, %v1387_v51 }
 0x23e   : > { %v1032_v3 = vpop.xlane.xlu0 %1031 }
 0x23f   : > { %v1304_v55 = vpop.xlane.xlu1 %1303  ;;  %2634 = vrsqrt.f32 %v1419_v49  ;;  %v1127_v59 = vmul.f32 0.00390625, %v1032_v3 }
 0x240   : > { %v1388_v57 = vmul.f32 0.00390625, %v1304_v55 }
 0x241   : > { %v3780_v16 = vsub.f32 %v3444_v62, %v1127_v59  ;;  %v3783_v26 = vsub.f32 %v3433_v52, %v1127_v59 }
 0x242   : > { %v1420_v41 = vadd.f32 1e-06, %v1388_v57  ;;  %v1307_v7 = vpop.xlane.xlu0 %1306 }
 0x243   : > { %4380 = vst [vmem:[#allocation21_spill] sm:$0xff] %v3780_v16  ;;  %4381 = vst [vmem:[#allocation22_spill] sm:$0xff] %v3783_v26  ;;  %v1035_v61 = vpop.xlane.xlu1 %1034  ;;  %v1389_v37 = vmul.f32 0.00390625, %v1307_v7  ;;  %v1223_v42 = vmul.f32 %v3780_v16, %v3780_v16  ;;  %v1224_v10 = vmul.f32 %v3783_v26, %v3783_v26  ;;  %v4390_v16 = vld [vmem:[#allocation26_spill] sm:$0xff] }
 0x244   : > { %2636 = vrsqrt.f32 %v1420_v41  ;;  %v1128_v0 = vmul.f32 0.00390625, %v1035_v61 }
 0x245   : > { %v1421_v55 = vadd.f32 1e-06, %v1389_v37  ;;  %v1287_v51 = vadd.f32 %v1224_v10, %v1223_v42 }
 0x246   : > { %v3790_v3 = vsub.f32 %v3472_v5, %v1128_v0  ;;  %v3793_v62 = vsub.f32 %v3468_v13, %v1128_v0  ;;  %v1116_v59 = vpop.xlane.xlu0 %1115  ;;  %v1543_v0 = vld [vmem:[%s4265_s3] sm:$0x3] }
 0x247   : > { %v1310_v52 = vpop.xlane.xlu1 %1309  ;;  %2638 = vrsqrt.f32 %v1421_v55  ;;  %v1155_v57 = vmul.f32 0.00390625, %v1116_v59  ;;  %1288 = vadd.xlane.f32.xlu0 %v1287_v51 }
 0x248   : > { %4382 = vst [vmem:[#allocation23_spill] sm:$0xff] %v3790_v3  ;;  %4383 = vst [vmem:[#allocation24_spill] sm:$0xff] %v3793_v62  ;;  %v1390_v49 = vmul.f32 0.00390625, %v1310_v52  ;;  %v1225_v41 = vmul.f32 %v3790_v3, %v3790_v3  ;;  %v1226_v61 = vmul.f32 %v3793_v62, %v3793_v62  ;;  %v4387_v62 = vld [vmem:[#allocation6_spill] sm:$0xff] }
 0x249   : > { %v3800_v5 = vsub.f32 %v3478_v14, %v1155_v57  ;;  %v3803_v13 = vsub.f32 %v3480_v9, %v1155_v57  ;;  %v1619_v14 = vld [vmem:[%s4266_s4] sm:$0x3] }
 0x24a   : > { %v1422_v7 = vadd.f32 1e-06, %v1390_v49  ;;  %v1313_v42 = vpop.xlane.xlu0 %1312  ;;  %v1290_v10 = vadd.f32 %v1226_v61, %v1225_v41  ;;  %v4386_v49 = vld [vmem:[#allocation5_spill] sm:$0xff]  ;;  %v3819_v41 = vrot.slane %v1543_v0, %v4387_v62 }
 0x24b   : > { %4384 = vst [vmem:[#allocation25_spill] sm:$0xff] %v3800_v5  ;;  %4385 = vst [vmem:[#allocation30_spill] sm:$0xff] %v3803_v13  ;;  %v1119_v37 = vpop.xlane.xlu1 %1118  ;;  %v1391_v52 = vmul.f32 0.00390625, %v1313_v42  ;;  %v1279_v59 = vmul.f32 %v3800_v5, %v3800_v5  ;;  %v1280_v9 = vmul.f32 %v3803_v13, %v3803_v13  ;;  %v3816_v57 = vrot.slane %v1543_v0, %v4386_v49  ;;  %v4389_v42 = vld [vmem:[#allocation27_spill] sm:$0xff] }
 0x24c   : > { %2640 = vrsqrt.f32 %v1422_v7  ;;  %v1156_v55 = vmul.f32 0.00390625, %v1119_v37  ;;  %v2635_v51 = vpop.eup %2634  ;;  %1291 = vadd.xlane.f32.xlu1 %v1290_v10  ;;  %v3829_v13 = vrot.slane %v1619_v14, %v4387_v62 }
 0x24d   : > { %v1423_v37 = vadd.f32 1e-06, %v1391_v52  ;;  %v1488_v5 = vmul.f32 %v2635_v51, %v4389_v42  ;;  %v1371_v26 = vadd.f32 %v1280_v9, %v1279_v59  ;;  %v1487_v32 = vmul.f32 %v2635_v51, %v4390_v16  ;;  %v4391_v51 = vld [vmem:[#allocation29_spill] sm:$0xff] }
 0x24e   : > { %v3822_v61 = vsub.f32 %v3500_v24, %v1156_v55  ;;  %v3825_v7 = vsub.f32 %v3502_v33, %v1156_v55  ;;  %v1038_v10 = vpop.xlane.xlu0 %1037  ;;  %v3838_v52 = vrot.slane %v1619_v14, %v4386_v49 }
 0x24f   : > { %v1316_v3 = vpop.xlane.xlu1 %1315  ;;  %2642 = vrsqrt.f32 %v1423_v37  ;;  %v1129_v38 = vmul.f32 0.00390625, %v1038_v10  ;;  %1372 = vadd.xlane.f32.xlu0 %v1371_v26  ;;  %v1564_v55 = vmul.f32 %v3819_v41, %v1488_v5  ;;  %v1563_v59 = vmul.f32 %v3816_v57, %v1487_v32  ;;  %v4392_v5 = vld [vmem:[#allocation28_spill] sm:$0xff] }
 0x250   : > { %4388 = vst [vmem:[#allocation31_spill] sm:$0xff] %v3822_v61  ;;  %v1392_v0 = vmul.f32 0.00390625, %v1316_v3  ;;  %v1281_v24 = vmul.f32 %v3822_v61, %v3822_v61  ;;  %v1282_v33 = vmul.f32 %v3825_v7, %v3825_v7 }
 0x251   : > { %v2637_v39 = vpop.eup %2636  ;;  %v3842_v16 = vsub.f32 %v3526_v23, %v1129_v38  ;;  %v3845_v3 = vsub.f32 %v3511_v12, %v1129_v38  ;;  %v1640_v62 = vadd.f32 %v3829_v13, %v1564_v55 }
 0x252   : > { %v1424_v9 = vadd.f32 1e-06, %v1392_v0  ;;  %v1490_v37 = vmul.f32 %v2637_v39, %v4391_v51  ;;  %v1319_v42 = vpop.xlane.xlu0 %1318  ;;  %v1374_v10 = vadd.f32 %v1282_v33, %v1281_v24  ;;  %v1489_v61 = vmul.f32 %v2637_v39, %v4392_v5 }
 0x253   : > { %v1041_v26 = vpop.xlane.xlu1 %1040  ;;  %v1393_v49 = vmul.f32 0.00390625, %v1319_v42  ;;  %v1227_v32 = vmul.f32 %v3842_v16, %v3842_v16  ;;  %v1228_v12 = vmul.f32 %v3845_v3, %v3845_v3  ;;  %v1639_v24 = vadd.f32 %v3838_v52, %v1563_v59 }
 0x254   : > { %2644 = vrsqrt.f32 %v1424_v9  ;;  %v1130_v14 = vmul.f32 0.00390625, %v1041_v26  ;;  %v2639_v23 = vpop.eup %2638  ;;  %1375 = vadd.xlane.f32.xlu1 %v1374_v10  ;;  %v1566_v38 = vmul.f32 %v3819_v41, %v1490_v37  ;;  %v1565_v0 = vmul.f32 %v3816_v57, %v1489_v61 }
 0x255   : > { %v1425_v55 = vadd.f32 1e-06, %v1393_v49  ;;  %v1492_v9 = vmul.f32 %v2639_v23, %v3466_v2  ;;  %v1293_v42 = vadd.f32 %v1228_v12, %v1227_v32  ;;  %v1491_v61 = vmul.f32 %v2639_v23, %v3463_v31 }
 0x256   : > { %v3858_v33 = vsub.f32 %v3546_v44, %v1130_v14  ;;  %v3861_v39 = vsub.f32 %v3537_v30, %v1130_v14  ;;  %v1122_v26 = vpop.xlane.xlu0 %1121  ;;  %v1642_v10 = vadd.f32 %v3829_v13, %v1566_v38  ;;  %v1641_v37 = vadd.f32 %v3838_v52, %v1565_v0 }
 0x257   : > { %v1322_v51 = vpop.xlane.xlu1 %1321  ;;  %2646 = vrsqrt.f32 %v1425_v55  ;;  %v1157_v5 = vmul.f32 0.00390625, %v1122_v26  ;;  %1294 = vadd.xlane.f32.xlu0 %v1293_v42  ;;  %v1568_v32 = vmul.f32 %v3819_v41, %v1492_v9  ;;  %v1567_v26 = vmul.f32 %v3816_v57, %v1491_v61 }
 0x258   : > { %v1394_v59 = vmul.f32 0.00390625, %v1322_v51  ;;  %v1229_v44 = vmul.f32 %v3858_v33, %v3858_v33  ;;  %v1700_v49 = vpack.c.bf16 %v1642_v10, %v1640_v62  ;;  %v1699_v14 = vpack.c.bf16 %v1641_v37, %v1639_v24 }
 0x259   : > { %v2641_v30 = vpop.eup %2640  ;;  %v1230_v2 = vmul.f32 %v3861_v39, %v3861_v39  ;;  %v3873_v38 = vsub.f32 %v3573_v34, %v1157_v5  ;;  %v3876_v31 = vsub.f32 %v3575_v21, %v1157_v5  ;;  %v1644_v62 = vadd.f32 %v3829_v13, %v1568_v32 }
 0x25a   : > { %v1426_v12 = vadd.f32 1e-06, %v1394_v59  ;;  %v1494_v23 = vmul.f32 %v2641_v30, %v3486_v15  ;;  %1983 = vmatprep.mubr.bf16.mxu1 %v1700_v49  ;;  %v1325_v55 = vpop.xlane.xlu0 %1324  ;;  %v1493_v24 = vmul.f32 %v2641_v30, %v3483_v43  ;;  %v1643_v43 = vadd.f32 %v3838_v52, %v1567_v26 }
 0x25b   : > { %v1125_v0 = vpop.xlane.xlu1 %1124  ;;  %v1296_v51 = vadd.f32 %v1230_v2, %v1229_v44  ;;  %1984 = vmatmul.mubr.bf16.vlgmr.msra.gmra.mxu1 %v1699_v14  ;;  %v1395_v34 = vmul.f32 0.00390625, %v1325_v55  ;;  %v1283_v21 = vmul.f32 %v3873_v38, %v3873_v38  ;;  %v1284_v15 = vmul.f32 %v3876_v31, %v3876_v31 }
 0x25c   : > { %2648 = vrsqrt.f32 %v1426_v12  ;;  %v1158_v9 = vmul.f32 0.00390625, %v1125_v0  ;;  %v2643_v42 = vpop.eup %2642  ;;  %v1570_v10 = vmul.f32 %v3819_v41, %v1494_v23  ;;  %v1569_v37 = vmul.f32 %v3816_v57, %v1493_v24 }
 0x25d   : > { %1297 = vadd.xlane.f32.xlu1 %v1296_v51  ;;  %v1427_v5 = vadd.f32 1e-06, %v1395_v34  ;;  %v1496_v44 = vmul.f32 %v2643_v42, %v3508_v1  ;;  %v1377_v49 = vadd.f32 %v1284_v15, %v1283_v21  ;;  %v1495_v32 = vmul.f32 %v2643_v42, %v3505_v29 }
 0x25e   : > { %v3890_v61 = vsub.f32 %v3592_v54, %v1158_v9  ;;  %v3893_v59 = vsub.f32 %v3594_v46, %v1158_v9  ;;  %v1646_v14 = vadd.f32 %v3829_v13, %v1570_v10  ;;  %v1645_v2 = vadd.f32 %v3838_v52, %v1569_v37 }
 0x25f   : > { %v1328_v30 = vpop.xlane.xlu1 %1327  ;;  %2650 = vrsqrt.f32 %v1427_v5  ;;  %1378 = vadd.xlane.f32.xlu0 %v1377_v49  ;;  %v1572_v55 = vmul.f32 %v3819_v41, %v1496_v44  ;;  %v1571_v51 = vmul.f32 %v3816_v57, %v1495_v32 }
 0x260   : > { %v1396_v12 = vmul.f32 0.00390625, %v1328_v30  ;;  %v1285_v54 = vmul.f32 %v3890_v61, %v3890_v61  ;;  %v1286_v46 = vmul.f32 %v3893_v59, %v3893_v59  ;;  %v1702_v0 = vpack.c.bf16 %v1646_v14, %v1644_v62 }
 0x261   : > { %v2645_v23 = vpop.eup %2644  ;;  %v1701_v1 = vpack.c.bf16 %v1645_v2, %v1643_v43  ;;  %v1648_v10 = vadd.f32 %v3829_v13, %v1572_v55  ;;  %v1647_v37 = vadd.f32 %v3838_v52, %v1571_v51 }
 0x262   : > { %v1428_v24 = vadd.f32 1e-06, %v1396_v12  ;;  %v1380_v26 = vadd.f32 %v1286_v46, %v1285_v54  ;;  %v1498_v29 = vmul.f32 %v2645_v23, %v3533_v18  ;;  %v1497_v9 = vmul.f32 %v2645_v23, %v3530_v56  ;;  %1993 = vmatprep.mubr.bf16.mxu1 %v1702_v0  ;;  %v1331_v34 = vpop.xlane.xlu0 %1330 }
 0x263   : > { %1994 = vmatmul.mubr.bf16.gmra.mxu1 %v1701_v1  ;;  %v1397_v21 = vmul.f32 0.00390625, %v1331_v34 }
 0x264   : > { %2652 = vrsqrt.f32 %v1428_v24  ;;  %1381 = vadd.xlane.f32.xlu1 %v1380_v26  ;;  %v1574_v42 = vmul.f32 %v3819_v41, %v1498_v29  ;;  %v1573_v62 = vmul.f32 %v3816_v57, %v1497_v9  ;;  %v2647_v15 = vpop.eup %2646 }
 0x265   : > { %v1429_v43 = vadd.f32 1e-06, %v1397_v21  ;;  %v1500_v5 = vmul.f32 %v2647_v15, %v3557_v60  ;;  %v1499_v30 = vmul.f32 %v2647_v15, %v3554_v58 }
 0x266   : > { %v1650_v18 = vadd.f32 %v3829_v13, %v1574_v42  ;;  %v1649_v56 = vadd.f32 %v3838_v52, %v1573_v62 }
 0x267   : > { %v1334_v44 = vpop.xlane.xlu1 %1333  ;;  %2654 = vrsqrt.f32 %v1429_v43  ;;  %v1576_v12 = vmul.f32 %v3819_v41, %v1500_v5  ;;  %v1575_v54 = vmul.f32 %v3816_v57, %v1499_v30 }
 0x268   : > { %v1398_v49 = vmul.f32 0.00390625, %v1334_v44  ;;  %v1704_v14 = vpack.c.bf16 %v1650_v18, %v1648_v10  ;;  %v1703_v2 = vpack.c.bf16 %v1649_v56, %v1647_v37 }
 0x269   : > { %v2649_v32 = vpop.eup %2648  ;;  %v1652_v24 = vadd.f32 %v3829_v13, %v1576_v12  ;;  %v1651_v26 = vadd.f32 %v3838_v52, %v1575_v54 }
 0x26a   : > { %v1430_v46 = vadd.f32 1e-06, %v1398_v49  ;;  %2003 = vmatprep.mubr.bf16.mxu1 %v1704_v14  ;;  %v1502_v23 = vmul.f32 %v2649_v32, %v3581_v27  ;;  %v1501_v0 = vmul.f32 %v2649_v32, %v3578_v28  ;;  %v1337_v1 = vpop.xlane.xlu0 %1336 }
 0x26b   : > { %2004 = vmatmul.mubr.bf16.gmra.mxu1 %v1703_v2  ;;  %v1399_v60 = vmul.f32 0.00390625, %v1337_v1 }
 0x26c   : > { %2656 = vrsqrt.f32 %v1430_v46  ;;  %v1578_v58 = vmul.f32 %v3819_v41, %v1502_v23  ;;  %v1577_v55 = vmul.f32 %v3816_v57, %v1501_v0  ;;  %v2651_v51 = vpop.eup %2650 }
 0x26d   : > { %v1431_v29 = vadd.f32 1e-06, %v1399_v60  ;;  %v1504_v28 = vmul.f32 %v2651_v51, %v3603_v45  ;;  %v1503_v21 = vmul.f32 %v2651_v51, %v3600_v50 }
 0x26e   : > { %v1654_v9 = vadd.f32 %v3829_v13, %v1578_v58  ;;  %v1653_v27 = vadd.f32 %v3838_v52, %v1577_v55 }
 0x26f   : > { %v1340_v34 = vpop.xlane.xlu1 %1339  ;;  %2658 = vrsqrt.f32 %v1431_v29  ;;  %v1580_v37 = vmul.f32 %v3819_v41, %v1504_v28  ;;  %v1579_v43 = vmul.f32 %v3816_v57, %v1503_v21 }
 0x270   : > { %v1400_v42 = vmul.f32 0.00390625, %v1340_v34  ;;  %v1706_v62 = vpack.c.bf16 %v1654_v9, %v1652_v24  ;;  %v1705_v15 = vpack.c.bf16 %v1653_v27, %v1651_v26 }
 0x271   : > { %v2653_v10 = vpop.eup %2652  ;;  %v1656_v14 = vadd.f32 %v3829_v13, %v1580_v37  ;;  %v1655_v2 = vadd.f32 %v3838_v52, %v1579_v43 }
 0x272   : > { %v1432_v18 = vadd.f32 1e-06, %v1400_v42  ;;  %2013 = vmatprep.mubr.bf16.mxu1 %v1706_v62  ;;  %v1506_v56 = vmul.f32 %v2653_v10, %v3621_v47  ;;  %v1505_v5 = vmul.f32 %v2653_v10, %v3618_v48  ;;  %v1343_v44 = vpop.xlane.xlu0 %1342 }
 0x273   : > { %2014 = vmatmul.mubr.bf16.gmra.mxu1 %v1705_v15  ;;  %v1401_v45 = vmul.f32 0.00390625, %v1343_v44 }
 0x274   : > { %2660 = vrsqrt.f32 %v1432_v18  ;;  %v1582_v50 = vmul.f32 %v3819_v41, %v1506_v56  ;;  %v1581_v30 = vmul.f32 %v3816_v57, %v1505_v5  ;;  %v2655_v49 = vpop.eup %2654 }
 0x275   : > { %v1433_v32 = vadd.f32 1e-06, %v1401_v45  ;;  %v1508_v48 = vmul.f32 %v2655_v49, %v3637_v36  ;;  %v1507_v46 = vmul.f32 %v2655_v49, %v3634_v6 }
 0x276   : > { %v1658_v12 = vadd.f32 %v3829_v13, %v1582_v50  ;;  %v1657_v47 = vadd.f32 %v3838_v52, %v1581_v30 }
 0x277   : > { %v1346_v54 = vpop.xlane.xlu1 %1345  ;;  %2662 = vrsqrt.f32 %v1433_v32  ;;  %v1584_v58 = vmul.f32 %v3819_v41, %v1508_v48  ;;  %v1583_v55 = vmul.f32 %v3816_v57, %v1507_v46 }
 0x278   : > { %v1402_v23 = vmul.f32 0.00390625, %v1346_v54  ;;  %v1708_v0 = vpack.c.bf16 %v1658_v12, %v1656_v14  ;;  %v1707_v1 = vpack.c.bf16 %v1657_v47, %v1655_v2 }
 0x279   : > { %v2657_v60 = vpop.eup %2656  ;;  %v1660_v28 = vadd.f32 %v3829_v13, %v1584_v58  ;;  %v1659_v34 = vadd.f32 %v3838_v52, %v1583_v55 }
 0x27a   : > { %v1434_v51 = vadd.f32 1e-06, %v1402_v23  ;;  %2023 = vmatprep.mubr.bf16.mxu1 %v1708_v0  ;;  %v1510_v24 = vmul.f32 %v2657_v60, %v3653_v63  ;;  %v1509_v26 = vmul.f32 %v2657_v60, %v3650_v11  ;;  %v1349_v29 = vpop.xlane.xlu0 %1348 }
 0x27b   : > { %2024 = vmatmul.mubr.bf16.gmra.mxu1 %v1707_v1  ;;  %v1403_v36 = vmul.f32 0.00390625, %v1349_v29 }
 0x27c   : > { %2664 = vrsqrt.f32 %v1434_v51  ;;  %v1586_v6 = vmul.f32 %v3819_v41, %v1510_v24  ;;  %v1585_v9 = vmul.f32 %v3816_v57, %v1509_v26  ;;  %v2659_v27 = vpop.eup %2658  ;;  %v4393_v26 = vld [vmem:[#allocation7_spill] sm:$0xff] }
 0x27d   : > { %v1435_v21 = vadd.f32 1e-06, %v1403_v36  ;;  %v1512_v11 = vmul.f32 %v2659_v27, %v3663_v20  ;;  %v1511_v15 = vmul.f32 %v2659_v27, %v3660_v35 }
 0x27e   : > { %v1662_v42 = vadd.f32 %v3829_v13, %v1586_v6  ;;  %v1661_v63 = vadd.f32 %v3838_v52, %v1585_v9 }
 0x27f   : > { %v1352_v62 = vpop.xlane.xlu1 %1351  ;;  %2666 = vrsqrt.f32 %v1435_v21  ;;  %v1588_v56 = vmul.f32 %v3819_v41, %v1512_v11  ;;  %v1587_v5 = vmul.f32 %v3816_v57, %v1511_v15 }
 0x280   : > { %v1404_v10 = vmul.f32 0.00390625, %v1352_v62  ;;  %v1710_v37 = vpack.c.bf16 %v1662_v42, %v1660_v28  ;;  %v1709_v43 = vpack.c.bf16 %v1661_v63, %v1659_v34 }
 0x281   : > { %v2661_v18 = vpop.eup %2660  ;;  %v1664_v2 = vadd.f32 %v3829_v13, %v1588_v56  ;;  %v1663_v32 = vadd.f32 %v3838_v52, %v1587_v5 }
 0x282   : > { %v1436_v44 = vadd.f32 1e-06, %v1404_v10  ;;  %2033 = vmatprep.mubr.bf16.mxu1 %v1710_v37  ;;  %v1514_v45 = vmul.f32 %v2661_v18, %v3673_v17  ;;  %v1513_v50 = vmul.f32 %v2661_v18, %v3670_v8  ;;  %v1355_v30 = vpop.xlane.xlu0 %1354 }
 0x283   : > { %2034 = vmatmul.mubr.bf16.gmra.mxu1 %v1709_v43  ;;  %v1405_v20 = vmul.f32 0.00390625, %v1355_v30 }
 0x284   : > { %2668 = vrsqrt.f32 %v1436_v44  ;;  %v1590_v35 = vmul.f32 %v3819_v41, %v1514_v45  ;;  %v1589_v49 = vmul.f32 %v3816_v57, %v1513_v50  ;;  %v2663_v14 = vpop.eup %2662  ;;  %v4394_v44 = vld [vmem:[#allocation8_spill] sm:$0xff] }
 0x285   : > { %v1437_v12 = vadd.f32 1e-06, %v1405_v20  ;;  %v1516_v8 = vmul.f32 %v2663_v14, %v3683_v19  ;;  %v1515_v46 = vmul.f32 %v2663_v14, %v3680_v4 }
 0x286   : > { %v1358_v47 = vpop.xlane.xlu1 %1357  ;;  %v1666_v48 = vadd.f32 %v3829_v13, %v1590_v35  ;;  %v1665_v17 = vadd.f32 %v3838_v52, %v1589_v49 }
 0x287   : > { %v1406_v54 = vmul.f32 0.00390625, %v1358_v47  ;;  %2670 = vrsqrt.f32 %v1437_v12  ;;  %v1592_v58 = vmul.f32 %v3819_v41, %v1516_v8  ;;  %v1591_v55 = vmul.f32 %v3816_v57, %v1515_v46  ;;  %v4396_v47 = vld [vmem:[#allocation9_spill] sm:$0xff] }
 0x288   : > { %v1712_v23 = vpack.c.bf16 %v1666_v48, %v1664_v2  ;;  %v1711_v0 = vpack.c.bf16 %v1665_v17, %v1663_v32  ;;  %v4395_v32 = vld [vmem:[#allocation10_spill] sm:$0xff] }
 0x289   : > { %v2665_v1 = vpop.eup %2664  ;;  %v1438_v60 = vadd.f32 1e-06, %v1406_v54  ;;  %v1668_v27 = vadd.f32 %v3829_v13, %v1592_v58  ;;  %v1667_v28 = vadd.f32 %v3838_v52, %v1591_v55  ;;  %v4398_v58 = vld [vmem:[#allocation11_spill] sm:$0xff] }
 0x28a   : > { %2043 = vmatprep.mubr.bf16.mxu1 %v1712_v23  ;;  %v1361_v51 = vpop.xlane.xlu0 %1360  ;;  %v1518_v24 = vmul.f32 %v2665_v1, %v3693_v53  ;;  %v1517_v29 = vmul.f32 %v2665_v1, %v4393_v26 }
 0x28b   : > { %2672 = vrsqrt.f32 %v1438_v60  ;;  %v1407_v19 = vmul.f32 0.00390625, %v1361_v51  ;;  %2044 = vmatmul.mubr.bf16.gmra.mxu1 %v1711_v0  ;;  %v4397_v0 = vld [vmem:[#allocation12_spill] sm:$0xff] }
 0x28c   : > { %v1594_v4 = vmul.f32 %v3819_v41, %v1518_v24  ;;  %v1593_v36 = vmul.f32 %v3816_v57, %v1517_v29  ;;  %v2667_v6 = vpop.eup %2666 }
 0x28d   : > { %v1439_v9 = vadd.f32 1e-06, %v1407_v19  ;;  %v1520_v42 = vmul.f32 %v2667_v6, %v3703_v22  ;;  %v1519_v63 = vmul.f32 %v2667_v6, %v3700_v25  ;;  %v4399_v6 = vld [vmem:[#allocation14_spill] sm:$0xff] }
 0x28e   : > { %v1364_v34 = vpop.xlane.xlu1 %1363  ;;  %v1670_v21 = vadd.f32 %v3829_v13, %v1594_v4  ;;  %v1669_v53 = vadd.f32 %v3838_v52, %v1593_v36 }
 0x28f   : > { %2674 = vrsqrt.f32 %v1439_v9  ;;  %v1408_v11 = vmul.f32 0.00390625, %v1364_v34  ;;  %v1596_v43 = vmul.f32 %v3819_v41, %v1520_v42  ;;  %v1595_v18 = vmul.f32 %v3816_v57, %v1519_v63  ;;  %v4401_v63 = vld [vmem:[#allocation16_spill] sm:$0xff] }
 0x290   : > { %v1714_v62 = vpack.c.bf16 %v1670_v21, %v1668_v27  ;;  %v1713_v15 = vpack.c.bf16 %v1669_v53, %v1667_v28  ;;  %v4400_v28 = vld [vmem:[#allocation13_spill] sm:$0xff] }
 0x291   : > { %v2669_v10 = vpop.eup %2668  ;;  %v1440_v37 = vadd.f32 1e-06, %v1408_v11  ;;  %v1672_v35 = vadd.f32 %v3829_v13, %v1596_v43  ;;  %v1671_v49 = vadd.f32 %v3838_v52, %v1595_v18 }
 0x292   : > { %2053 = vmatprep.mubr.bf16.mxu1 %v1714_v62  ;;  %v1367_v56 = vpop.xlane.xlu0 %1366  ;;  %v1522_v5 = vmul.f32 %v2669_v10, %v3713_v40  ;;  %v1521_v45 = vmul.f32 %v2669_v10, %v4394_v44 }
 0x293   : > { %2676 = vrsqrt.f32 %v1440_v37  ;;  %v1409_v22 = vmul.f32 0.00390625, %v1367_v56  ;;  %2054 = vmatmul.mubr.bf16.gmra.mxu1 %v1713_v15  ;;  %v4402_v15 = vld [vmem:[#allocation15_spill] sm:$0xff] }
 0x294   : > { %v1598_v25 = vmul.f32 %v3819_v41, %v1522_v5  ;;  %v1597_v50 = vmul.f32 %v3816_v57, %v1521_v45  ;;  %v2671_v30 = vpop.eup %2670 }
 0x295   : > { %v1441_v20 = vadd.f32 1e-06, %v1409_v22  ;;  %v1524_v12 = vmul.f32 %v2671_v30, %v4395_v32  ;;  %v1523_v48 = vmul.f32 %v2671_v30, %v4396_v47  ;;  %v4403_v22 = vld [vmem:[#allocation18_spill] sm:$0xff]  ;;  %v4404_v30 = vld [vmem:[#allocation17_spill] sm:$0xff] }
 0x296   : > { %v1370_v14 = vpop.xlane.xlu1 %1369  ;;  %v1674_v2 = vadd.f32 %v3829_v13, %v1598_v25  ;;  %v1673_v40 = vadd.f32 %v3838_v52, %v1597_v50 }
 0x297   : > { %2678 = vrsqrt.f32 %v1441_v20  ;;  %v1410_v17 = vmul.f32 0.00390625, %v1370_v14  ;;  %v1600_v60 = vmul.f32 %v3819_v41, %v1524_v12  ;;  %v1599_v51 = vmul.f32 %v3816_v57, %v1523_v48  ;;  %v4406_v12 = vld [vmem:[#allocation19_spill] sm:$0xff] }
 0x298   : > { %v2673_v8 = vpop.eup %2672  ;;  %v1716_v54 = vpack.c.bf16 %v1674_v2, %v1672_v35  ;;  %v1715_v46 = vpack.c.bf16 %v1673_v40, %v1671_v49  ;;  %v4405_v2 = vld [vmem:[#allocation20_spill] sm:$0xff] }
 0x299   : > { %v1442_v23 = vadd.f32 1e-06, %v1410_v17  ;;  %v1526_v1 = vmul.f32 %v2673_v8, %v4397_v0  ;;  %v1525_v55 = vmul.f32 %v2673_v8, %v4398_v58  ;;  %v1676_v19 = vadd.f32 %v3829_v13, %v1600_v60 }
 0x29a   : > { %2063 = vmatprep.mubr.bf16.mxu1 %v1716_v54  ;;  %v1675_v27 = vadd.f32 %v3838_v52, %v1599_v51 }
 0x29b   : > { %2680 = vrsqrt.f32 %v1442_v23  ;;  %v1602_v24 = vmul.f32 %v3819_v41, %v1526_v1  ;;  %v1601_v26 = vmul.f32 %v3816_v57, %v1525_v55  ;;  %2064 = vmatmul.mubr.bf16.gmra.mxu1 %v1715_v46 }
 0x29c   : > { %v2675_v29 = vpop.eup %2674 }
 0x29d   : > { %v1678_v4 = vadd.f32 %v3829_v13, %v1602_v24  ;;  %v1677_v36 = vadd.f32 %v3838_v52, %v1601_v26  ;;  %v1528_v9 = vmul.f32 %v2675_v29, %v4399_v6  ;;  %v1527_v34 = vmul.f32 %v2675_v29, %v4400_v28 }
 0x29f   : > { %v1718_v21 = vpack.c.bf16 %v1678_v4, %v1676_v19  ;;  %v1717_v42 = vpack.c.bf16 %v1677_v36, %v1675_v27  ;;  %v1604_v62 = vmul.f32 %v3819_v41, %v1528_v9  ;;  %v1603_v37 = vmul.f32 %v3816_v57, %v1527_v34 }
 0x2a0   : > { %v2677_v53 = vpop.eup %2676 }
 0x2a1   : > { %2073 = vmatprep.mubr.bf16.mxu1 %v1718_v21  ;;  %v1530_v11 = vmul.f32 %v2677_v53, %v4401_v63  ;;  %v1529_v10 = vmul.f32 %v2677_v53, %v4402_v15  ;;  %v1680_v5 = vadd.f32 %v3829_v13, %v1604_v62  ;;  %v1679_v50 = vadd.f32 %v3838_v52, %v1603_v37  ;;  %v4407_v53 = vld [vmem:[#allocation21_spill] sm:$0xff] }
 0x2a3   : > { %v1606_v43 = vmul.f32 %v3819_v41, %v1530_v11  ;;  %v1605_v18 = vmul.f32 %v3816_v57, %v1529_v10  ;;  %2074 = vmatmul.mubr.bf16.gmra.mxu1 %v1717_v42  ;;  %v4408_v11 = vld [vmem:[#allocation22_spill] sm:$0xff] }
 0x2a4   : > { %v2679_v56 = vpop.eup %2678 }
 0x2a5   : > { %v1682_v44 = vadd.f32 %v3829_v13, %v1606_v43  ;;  %v1681_v45 = vadd.f32 %v3838_v52, %v1605_v18  ;;  %v1532_v25 = vmul.f32 %v2679_v56, %v4403_v22  ;;  %v1531_v20 = vmul.f32 %v2679_v56, %v4404_v30  ;;  %v4409_v56 = vld [vmem:[#allocation23_spill] sm:$0xff] }
 0x2a7   : > { %v1720_v35 = vpack.c.bf16 %v1682_v44, %v1680_v5  ;;  %v1719_v14 = vpack.c.bf16 %v1681_v45, %v1679_v50  ;;  %v1608_v32 = vmul.f32 %v3819_v41, %v1532_v25  ;;  %v1607_v48 = vmul.f32 %v3816_v57, %v1531_v20  ;;  %v4410_v45 = vld [vmem:[#allocation24_spill] sm:$0xff] }
 0x2a8   : > { %v2681_v49 = vpop.eup %2680 }
 0x2a9   : > { %2083 = vmatprep.mubr.bf16.mxu1 %v1720_v35  ;;  %v1534_v40 = vmul.f32 %v2681_v49, %v4405_v2  ;;  %v1533_v47 = vmul.f32 %v2681_v49, %v4406_v12  ;;  %v1684_v54 = vadd.f32 %v3829_v13, %v1608_v32  ;;  %v1683_v0 = vadd.f32 %v3838_v52, %v1607_v48 }
 0x2ab   : > { %v1610_v17 = vmul.f32 %v3819_v41, %v1534_v40  ;;  %v1609_v8 = vmul.f32 %v3816_v57, %v1533_v47  ;;  %2084 = vmatmul.mubr.bf16.gmra.mxu1 %v1719_v14  ;;  %v4411_v47 = vld [vmem:[#allocation30_spill] sm:$0xff] }
 0x2ad   : > { %v1686_v46 = vadd.f32 %v3829_v13, %v1610_v17  ;;  %v1685_v23 = vadd.f32 %v3838_v52, %v1609_v8  ;;  %v4412_v8 = vld [vmem:[#allocation25_spill] sm:$0xff] }
 0x2af   : > { %v1722_v1 = vpack.c.bf16 %v1686_v46, %v1684_v54  ;;  %v1721_v60 = vpack.c.bf16 %v1685_v23, %v1683_v0 }
 0x2b1   : > { %2093 = vmatprep.mubr.bf16.mxu1 %v1722_v1 }
 0x2b3   : > { %2094 = vmatmul.mubr.bf16.gmra.mxu1 %v1721_v60 }
 0x2d0   : > { %v1289_v58 = vpop.xlane.xlu0 %1288 }
 0x2d1   : > { %v1383_v55 = vmul.f32 0.00390625, %v1289_v58 }
 0x2d3   : > { %v1415_v51 = vadd.f32 1e-06, %v1383_v55 }
 0x2d5   : > { %v1292_v24 = vpop.xlane.xlu1 %1291  ;;  %2682 = vrsqrt.f32 %v1415_v51  ;;  %v4413_v51 = vld [vmem:[#allocation31_spill] sm:$0xff] }
 0x2d6   : > { %v1384_v26 = vmul.f32 0.00390625, %v1292_v24 }
 0x2d8   : > { %v1416_v29 = vadd.f32 1e-06, %v1384_v26  ;;  %v1373_v19 = vpop.xlane.xlu0 %1372 }
 0x2d9   : > { %v1411_v4 = vmul.f32 0.00390625, %v1373_v19 }
 0x2da   : > { %2684 = vrsqrt.f32 %v1416_v29 }
 0x2db   : > { %v1443_v36 = vadd.f32 1e-06, %v1411_v4 }
 0x2dd   : > { %v1376_v6 = vpop.xlane.xlu1 %1375  ;;  %2686 = vrsqrt.f32 %v1443_v36 }
 0x2de   : > { %v1412_v9 = vmul.f32 0.00390625, %v1376_v6 }
 0x2e0   : > { %v1444_v27 = vadd.f32 1e-06, %v1412_v9  ;;  %v1295_v28 = vpop.xlane.xlu0 %1294 }
 0x2e1   : > { %v1385_v34 = vmul.f32 0.00390625, %v1295_v28 }
 0x2e2   : > { %2688 = vrsqrt.f32 %v1444_v27  ;;  %v2683_v21 = vpop.eup %2682 }
 0x2e3   : > { %v1479_v42 = vmul.f32 %v2683_v21, %v4407_v53  ;;  %v1417_v63 = vadd.f32 1e-06, %v1385_v34  ;;  %v1480_v62 = vmul.f32 %v2683_v21, %v4408_v11 }
 0x2e5   : > { %2690 = vrsqrt.f32 %v1417_v63  ;;  %v1556_v43 = vmul.f32 %v3819_v41, %v1480_v62  ;;  %v1555_v18 = vmul.f32 %v3816_v57, %v1479_v42 }
 0x2e6   : > { %v1298_v15 = vpop.xlane.xlu1 %1297 }
 0x2e7   : > { %v1386_v10 = vmul.f32 0.00390625, %v1298_v15  ;;  %v2685_v37 = vpop.eup %2684  ;;  %v1632_v49 = vadd.f32 %v3829_v13, %v1556_v43  ;;  %v1631_v14 = vadd.f32 %v3838_v52, %v1555_v18 }
 0x2e8   : > { %v1481_v5 = vmul.f32 %v2685_v37, %v4409_v56  ;;  %v1482_v22 = vmul.f32 %v2685_v37, %v4410_v45  ;;  %v1379_v25 = vpop.xlane.xlu0 %1378 }
 0x2e9   : > { %v1418_v44 = vadd.f32 1e-06, %v1386_v10  ;;  %v1413_v50 = vmul.f32 0.00390625, %v1379_v25 }
 0x2ea   : > { %v1558_v30 = vmul.f32 %v3819_v41, %v1482_v22  ;;  %v1557_v20 = vmul.f32 %v3816_v57, %v1481_v5  ;;  %v2687_v35 = vpop.eup %2686 }
 0x2eb   : > { %2692 = vrsqrt.f32 %v1418_v44  ;;  %v1445_v2 = vadd.f32 1e-06, %v1413_v50  ;;  %v1536_v48 = vmul.f32 %v2687_v35, %v4411_v47  ;;  %v1535_v54 = vmul.f32 %v2687_v35, %v4412_v8 }
 0x2ec   : > { %v1634_v32 = vadd.f32 %v3829_v13, %v1558_v30  ;;  %v1633_v12 = vadd.f32 %v3838_v52, %v1557_v20 }
 0x2ed   : > { %v1382_v40 = vpop.xlane.xlu1 %1381  ;;  %2694 = vrsqrt.f32 %v1445_v2  ;;  %v1612_v60 = vmul.f32 %v3819_v41, %v1536_v48  ;;  %v1611_v58 = vmul.f32 %v3816_v57, %v1535_v54 }
 0x2ee   : > { %v1414_v17 = vmul.f32 0.00390625, %v1382_v40  ;;  %v1696_v46 = vpack.c.bf16 %v1634_v32, %v1632_v49  ;;  %v1695_v23 = vpack.c.bf16 %v1633_v12, %v1631_v14  ;;  %v4415_v14 = vld [vmem:[#allocation6_spill] sm:$0xff] }
 0x2ef   : > { %v2689_v0 = vpop.eup %2688  ;;  %v1688_v4 = vadd.f32 %v3829_v13, %v1612_v60  ;;  %v1687_v36 = vadd.f32 %v3838_v52, %v1611_v58 }
 0x2f0   : > { %v1446_v1 = vadd.f32 1e-06, %v1414_v17  ;;  %1963 = vmatprep.mubr.bf16.mxu0 %v1696_v46  ;;  %v1538_v55 = vmul.f32 %v2689_v0, %v3825_v7  ;;  %v1537_v24 = vmul.f32 %v2689_v0, %v4413_v51 }
 0x2f1   : > { %1964 = vmatmul.mubr.bf16.vlgmr.msra.gmra.mxu0 %v1695_v23 }
 0x2f2   : > { %2696 = vrsqrt.f32 %v1446_v1  ;;  %v1614_v26 = vmul.f32 %v3819_v41, %v1538_v55  ;;  %v1613_v29 = vmul.f32 %v3816_v57, %v1537_v24  ;;  %v2691_v19 = vpop.eup %2690 }
 0x2f3   : > { %v1484_v27 = vmul.f32 %v2691_v19, %v3845_v3  ;;  %v1483_v7 = vmul.f32 %v2691_v19, %v3842_v16 }
 0x2f4   : > { %v1690_v6 = vadd.f32 %v3829_v13, %v1614_v26  ;;  %v1689_v9 = vadd.f32 %v3838_v52, %v1613_v29 }
 0x2f5   : > { %v1560_v53 = vmul.f32 %v3819_v41, %v1484_v27  ;;  %v1559_v42 = vmul.f32 %v3816_v57, %v1483_v7 }
 0x2f6   : > { %v1724_v28 = vpack.c.bf16 %v1690_v6, %v1688_v4  ;;  %v1723_v34 = vpack.c.bf16 %v1689_v9, %v1687_v36 }
 0x2f7   : > { %v1636_v16 = vadd.f32 %v3829_v13, %v1560_v53  ;;  %v1635_v10 = vadd.f32 %v3838_v52, %v1559_v42 }
 0x2f8   : > { %v2693_v21 = vpop.eup %2692  ;;  %2103 = vmatprep.mubr.bf16.mxu1 %v1724_v28 }
 0x2f9   : > { %v1486_v63 = vmul.f32 %v2693_v21, %v3861_v39  ;;  %v1485_v11 = vmul.f32 %v2693_v21, %v3858_v33  ;;  %2104 = vmatmul.mubr.bf16.gmra.mxu1 %v1723_v34 }
 0x2fa   : > { %v2695_v3 = vpop.eup %2694 }
 0x2fb   : > { %v1562_v62 = vmul.f32 %v3819_v41, %v1486_v63  ;;  %v1561_v15 = vmul.f32 %v3816_v57, %v1485_v11  ;;  %v1540_v18 = vmul.f32 %v2695_v3, %v3876_v31  ;;  %v1539_v39 = vmul.f32 %v2695_v3, %v3873_v38 }
 0x2fd   : > { %v1638_v37 = vadd.f32 %v3829_v13, %v1562_v62  ;;  %v1637_v43 = vadd.f32 %v3838_v52, %v1561_v15  ;;  %v1616_v45 = vmul.f32 %v3819_v41, %v1540_v18  ;;  %v1615_v25 = vmul.f32 %v3816_v57, %v1539_v39 }
 0x2ff   : > { %v2697_v56 = vpop.eup %2696  ;;  %v1698_v33 = vpack.c.bf16 %v1638_v37, %v1636_v16  ;;  %v1697_v5 = vpack.c.bf16 %v1637_v43, %v1635_v10  ;;  %v1692_v38 = vadd.f32 %v3829_v13, %v1616_v45 }
 0x300   : > { %v1542_v44 = vmul.f32 %v2697_v56, %v3893_v59  ;;  %v1541_v22 = vmul.f32 %v2697_v56, %v3890_v61  ;;  %v1691_v59 = vadd.f32 %v3838_v52, %v1615_v25  ;;  %v1759_v61 = vld [vmem:[%s4268_s6] sm:$0x3] }
 0x301   : > { %1973 = vmatprep.mubr.bf16.mxu0 %v1698_v33 }
 0x302   : > { %1974 = vmatmul.mubr.bf16.gmra.mxu0 %v1697_v5  ;;  %v1618_v50 = vmul.f32 %v3819_v41, %v1542_v44  ;;  %v1617_v31 = vmul.f32 %v3816_v57, %v1541_v22  ;;  %v4414_v57 = vld [vmem:[#allocation5_spill] sm:$0xff] }
 0x303   : > { %v4076_v41 = vrot.slane %v1759_v61, %v4414_v57 }
 0x304   : > { %v1694_v30 = vadd.f32 %v3829_v13, %v1618_v50  ;;  %v1693_v20 = vadd.f32 %v3838_v52, %v1617_v31  ;;  %v4079_v13 = vrot.slane %v1759_v61, %v4415_v14 }
 0x306   : > { %v1726_v35 = vpack.c.bf16 %v1694_v30, %v1692_v38  ;;  %v1725_v49 = vpack.c.bf16 %v1693_v20, %v1691_v59 }
 0x308   : > { %2113 = vmatprep.mubr.bf16.mxu1 %v1726_v35 }
 0x309   : > { %2114 = vmatmul.mubr.bf16.gmra.mxu1 %v1725_v49 }
 0x31b   : > { %v1985_v2 = vpop.f32.mrf.mxu1 }
 0x31c   : > { %v1986_v52 = vadd.f32 %v1985_v2, %v4076_v41 }
 0x31d   : > { %v1987_v40 = vpop.f32.mrf.mxu1 }
 0x31e   : > { %2132 = vst [vmem:[%s4082_s9 + $0x40] sm:$0xff] %v1986_v52  ;;  %v1988_v32 = vadd.f32 %v1987_v40, %v4079_v13 }
 0x31f   : > { %v1989_v12 = vpop.f32.mrf.mxu1 }
 0x320   : > { %2133 = vst [vmem:[%s4082_s9 + $0x48] sm:$0xff] %v1988_v32  ;;  %v1990_v47 = vadd.f32 %v1989_v12, %v4076_v41 }
 0x321   : > { %v1991_v48 = vpop.f32.mrf.mxu1 }
 0x322   : > { %2134 = vst [vmem:[%s4082_s9 + $0x50] sm:$0xff] %v1990_v47  ;;  %v1992_v17 = vadd.f32 %v1991_v48, %v4079_v13 }
 0x323   : > { %v1995_v8 = vpop.f32.mrf.mxu1 }
 0x324   : > { %2135 = vst [vmem:[%s4082_s9 + $0x58] sm:$0xff] %v1992_v17  ;;  %v1996_v54 = vadd.f32 %v1995_v8, %v4076_v41 }
 0x325   : > { %v1997_v46 = vpop.f32.mrf.mxu1 }
 0x326   : > { %2136 = vst [vmem:[%s4082_s9 + $0x60] sm:$0xff] %v1996_v54  ;;  %v1998_v23 = vadd.f32 %v1997_v46, %v4079_v13 }
 0x327   : > { %v1999_v0 = vpop.f32.mrf.mxu1 }
 0x328   : > { %2137 = vst [vmem:[%s4082_s9 + $0x68] sm:$0xff] %v1998_v23  ;;  %v2000_v1 = vadd.f32 %v1999_v0, %v4076_v41 }
 0x329   : > { %v2001_v60 = vpop.f32.mrf.mxu1 }
 0x32a   : > { %2138 = vst [vmem:[%s4082_s9 + $0x70] sm:$0xff] %v2000_v1  ;;  %v2002_v58 = vadd.f32 %v2001_v60, %v4079_v13 }
 0x32b   : > { %v2005_v55 = vpop.f32.mrf.mxu1 }
 0x32c   : > { %2139 = vst [vmem:[%s4082_s9 + $0x78] sm:$0xff] %v2002_v58  ;;  %v2006_v51 = vadd.f32 %v2005_v55, %v4076_v41 }
 0x32d   : > { %v2007_v24 = vpop.f32.mrf.mxu1 }
 0x32e   : > { %2140 = vst [vmem:[%s4082_s9 + $0x80] sm:$0xff] %v2006_v51  ;;  %v2008_v26 = vadd.f32 %v2007_v24, %v4079_v13 }
 0x32f   : > { %v2009_v29 = vpop.f32.mrf.mxu1 }
 0x330   : > { %2141 = vst [vmem:[%s4082_s9 + $0x88] sm:$0xff] %v2008_v26  ;;  %v2010_v19 = vadd.f32 %v2009_v29, %v4076_v41 }
 0x331   : > { %v2011_v4 = vpop.f32.mrf.mxu1 }
 0x332   : > { %2142 = vst [vmem:[%s4082_s9 + $0x90] sm:$0xff] %v2010_v19  ;;  %v2012_v36 = vadd.f32 %v2011_v4, %v4079_v13 }
 0x333   : > { %v2015_v6 = vpop.f32.mrf.mxu1 }
 0x334   : > { %2143 = vst [vmem:[%s4082_s9 + $0x98] sm:$0xff] %v2012_v36  ;;  %v2016_v9 = vadd.f32 %v2015_v6, %v4076_v41 }
 0x335   : > { %v2017_v27 = vpop.f32.mrf.mxu1 }
 0x336   : > { %2144 = vst [vmem:[%s4082_s9 + $0xa0] sm:$0xff] %v2016_v9  ;;  %v2018_v7 = vadd.f32 %v2017_v27, %v4079_v13 }
 0x337   : > { %v2019_v28 = vpop.f32.mrf.mxu1 }
 0x338   : > { %2145 = vst [vmem:[%s4082_s9 + $0xa8] sm:$0xff] %v2018_v7  ;;  %v2020_v34 = vadd.f32 %v2019_v28, %v4076_v41 }
 0x339   : > { %v2021_v21 = vpop.f32.mrf.mxu1 }
 0x33a   : > { %2146 = vst [vmem:[%s4082_s9 + $0xb0] sm:$0xff] %v2020_v34  ;;  %v2022_v53 = vadd.f32 %v2021_v21, %v4079_v13 }
 0x33b   : > { %v2025_v42 = vpop.f32.mrf.mxu1 }
 0x33c   : > { %2147 = vst [vmem:[%s4082_s9 + $0xb8] sm:$0xff] %v2022_v53  ;;  %v2026_v63 = vadd.f32 %v2025_v42, %v4076_v41 }
 0x33d   : > { %v2027_v11 = vpop.f32.mrf.mxu1 }
 0x33e   : > { %2148 = vst [vmem:[%s4082_s9 + $0xc0] sm:$0xff] %v2026_v63  ;;  %v2028_v62 = vadd.f32 %v2027_v11, %v4079_v13 }
 0x33f   : > { %v2029_v15 = vpop.f32.mrf.mxu1 }
 0x340   : > { %2149 = vst [vmem:[%s4082_s9 + $0xc8] sm:$0xff] %v2028_v62  ;;  %v2030_v3 = vadd.f32 %v2029_v15, %v4076_v41 }
 0x341   : > { %v2031_v16 = vpop.f32.mrf.mxu1 }
 0x342   : > { %2150 = vst [vmem:[%s4082_s9 + $0xd0] sm:$0xff] %v2030_v3  ;;  %v2032_v10 = vadd.f32 %v2031_v16, %v4079_v13 }
 0x343   : > { %v2035_v37 = vpop.f32.mrf.mxu1 }
 0x344   : > { %2151 = vst [vmem:[%s4082_s9 + $0xd8] sm:$0xff] %v2032_v10  ;;  %v2036_v43 = vadd.f32 %v2035_v37, %v4076_v41 }
 0x345   : > { %v2037_v18 = vpop.f32.mrf.mxu1 }
 0x346   : > { %2152 = vst [vmem:[%s4082_s9 + $0xe0] sm:$0xff] %v2036_v43  ;;  %v2038_v39 = vadd.f32 %v2037_v18, %v4079_v13 }
 0x347   : > { %v2039_v56 = vpop.f32.mrf.mxu1 }
 0x348   : > { %2153 = vst [vmem:[%s4082_s9 + $0xe8] sm:$0xff] %v2038_v39  ;;  %v2040_v33 = vadd.f32 %v2039_v56, %v4076_v41 }
 0x349   : > { %v2041_v5 = vpop.f32.mrf.mxu1 }
 0x34a   : > { %2154 = vst [vmem:[%s4082_s9 + $0xf0] sm:$0xff] %v2040_v33  ;;  %v2042_v44 = vadd.f32 %v2041_v5, %v4079_v13 }
 0x34b   : > { %v2045_v45 = vpop.f32.mrf.mxu1 }
 0x34c   : > { %2155 = vst [vmem:[%s4082_s9 + $0xf8] sm:$0xff] %v2042_v44  ;;  %v2046_v22 = vadd.f32 %v2045_v45, %v4076_v41 }
 0x34d   : > { %v2047_v25 = vpop.f32.mrf.mxu1 }
 0x34e   : > { %2156 = vst [vmem:[%s4082_s9 + $0x100] sm:$0xff] %v2046_v22  ;;  %v2048_v50 = vadd.f32 %v2047_v25, %v4079_v13 }
 0x34f   : > { %v2049_v31 = vpop.f32.mrf.mxu1 }
 0x350   : > { %2157 = vst [vmem:[%s4082_s9 + $0x108] sm:$0xff] %v2048_v50  ;;  %v2050_v38 = vadd.f32 %v2049_v31, %v4076_v41 }
 0x351   : > { %v2051_v30 = vpop.f32.mrf.mxu1 }
 0x352   : > { %2158 = vst [vmem:[%s4082_s9 + $0x110] sm:$0xff] %v2050_v38  ;;  %v2052_v59 = vadd.f32 %v2051_v30, %v4079_v13 }
 0x353   : > { %v2055_v20 = vpop.f32.mrf.mxu1 }
 0x354   : > { %2159 = vst [vmem:[%s4082_s9 + $0x118] sm:$0xff] %v2052_v59  ;;  %v2056_v35 = vadd.f32 %v2055_v20, %v4076_v41 }
 0x355   : > { %v2057_v49 = vpop.f32.mrf.mxu1 }
 0x356   : > { %2160 = vst [vmem:[%s4082_s9 + $0x120] sm:$0xff] %v2056_v35  ;;  %v2058_v61 = vadd.f32 %v2057_v49, %v4079_v13 }
 0x357   : > { %v2059_v57 = vpop.f32.mrf.mxu1 }
 0x358   : > { %2161 = vst [vmem:[%s4082_s9 + $0x128] sm:$0xff] %v2058_v61  ;;  %v2060_v14 = vadd.f32 %v2059_v57, %v4076_v41 }
 0x359   : > { %v2061_v2 = vpop.f32.mrf.mxu1 }
 0x35a   : > { %2162 = vst [vmem:[%s4082_s9 + $0x130] sm:$0xff] %v2060_v14  ;;  %v2062_v52 = vadd.f32 %v2061_v2, %v4079_v13 }
 0x35b   : > { %v2065_v40 = vpop.f32.mrf.mxu1 }
 0x35c   : > { %2163 = vst [vmem:[%s4082_s9 + $0x138] sm:$0xff] %v2062_v52  ;;  %v2066_v32 = vadd.f32 %v2065_v40, %v4076_v41 }
 0x35d   : > { %v2067_v12 = vpop.f32.mrf.mxu1 }
 0x35e   : > { %2164 = vst [vmem:[%s4082_s9 + $0x140] sm:$0xff] %v2066_v32  ;;  %v2068_v47 = vadd.f32 %v2067_v12, %v4079_v13 }
 0x35f   : > { %v2069_v48 = vpop.f32.mrf.mxu1 }
 0x360   : > { %2165 = vst [vmem:[%s4082_s9 + $0x148] sm:$0xff] %v2068_v47  ;;  %v2070_v17 = vadd.f32 %v2069_v48, %v4076_v41 }
 0x361   : > { %v2071_v8 = vpop.f32.mrf.mxu1 }
 0x362   : > { %2166 = vst [vmem:[%s4082_s9 + $0x150] sm:$0xff] %v2070_v17  ;;  %v2072_v54 = vadd.f32 %v2071_v8, %v4079_v13 }
 0x363   : > { %v2075_v46 = vpop.f32.mrf.mxu1 }
 0x364   : > { %2167 = vst [vmem:[%s4082_s9 + $0x158] sm:$0xff] %v2072_v54  ;;  %v2076_v23 = vadd.f32 %v2075_v46, %v4076_v41 }
 0x365   : > { %v2077_v0 = vpop.f32.mrf.mxu1 }
 0x366   : > { %2168 = vst [vmem:[%s4082_s9 + $0x160] sm:$0xff] %v2076_v23  ;;  %v2078_v1 = vadd.f32 %v2077_v0, %v4079_v13 }
 0x367   : > { %v2079_v60 = vpop.f32.mrf.mxu1 }
 0x368   : > { %2169 = vst [vmem:[%s4082_s9 + $0x168] sm:$0xff] %v2078_v1  ;;  %v2080_v58 = vadd.f32 %v2079_v60, %v4076_v41 }
 0x369   : > { %v2081_v55 = vpop.f32.mrf.mxu1 }
 0x36a   : > { %2170 = vst [vmem:[%s4082_s9 + $0x170] sm:$0xff] %v2080_v58  ;;  %v2082_v51 = vadd.f32 %v2081_v55, %v4079_v13 }
 0x36b   : > { %v2085_v24 = vpop.f32.mrf.mxu1 }
 0x36c   : > { %2171 = vst [vmem:[%s4082_s9 + $0x178] sm:$0xff] %v2082_v51  ;;  %v2086_v26 = vadd.f32 %v2085_v24, %v4076_v41 }
 0x36d   : > { %v2087_v29 = vpop.f32.mrf.mxu1 }
 0x36e   : > { %2172 = vst [vmem:[%s4082_s9 + $0x180] sm:$0xff] %v2086_v26  ;;  %v2088_v19 = vadd.f32 %v2087_v29, %v4079_v13 }
 0x36f   : > { %v2089_v4 = vpop.f32.mrf.mxu1 }
 0x370   : > { %2173 = vst [vmem:[%s4082_s9 + $0x188] sm:$0xff] %v2088_v19  ;;  %v2090_v36 = vadd.f32 %v2089_v4, %v4076_v41 }
 0x371   : > { %v2091_v6 = vpop.f32.mrf.mxu1 }
 0x372   : > { %2174 = vst [vmem:[%s4082_s9 + $0x190] sm:$0xff] %v2090_v36  ;;  %v2092_v9 = vadd.f32 %v2091_v6, %v4079_v13 }
 0x373   : > { %v2095_v27 = vpop.f32.mrf.mxu1 }
 0x374   : > { %2175 = vst [vmem:[%s4082_s9 + $0x198] sm:$0xff] %v2092_v9  ;;  %v2096_v7 = vadd.f32 %v2095_v27, %v4076_v41 }
 0x375   : > { %v2097_v28 = vpop.f32.mrf.mxu1 }
 0x376   : > { %2176 = vst [vmem:[%s4082_s9 + $0x1a0] sm:$0xff] %v2096_v7  ;;  %v2098_v34 = vadd.f32 %v2097_v28, %v4079_v13 }
 0x377   : > { %v2099_v21 = vpop.f32.mrf.mxu1 }
 0x378   : > { %2177 = vst [vmem:[%s4082_s9 + $0x1a8] sm:$0xff] %v2098_v34  ;;  %v2100_v53 = vadd.f32 %v2099_v21, %v4076_v41 }
 0x379   : > { %v2101_v42 = vpop.f32.mrf.mxu1 }
 0x37a   : > { %2178 = vst [vmem:[%s4082_s9 + $0x1b0] sm:$0xff] %v2100_v53  ;;  %v2102_v63 = vadd.f32 %v2101_v42, %v4079_v13 }
 0x37c   : > { %2179 = vst [vmem:[%s4082_s9 + $0x1b8] sm:$0xff] %v2102_v63 }
 0x3b1   : > { %v1965_v11 = vpop.f32.mrf.mxu0 }
 0x3b2   : > { %v1966_v62 = vadd.f32 %v1965_v11, %v4076_v41 }
 0x3b3   : > { %v1967_v15 = vpop.f32.mrf.mxu0 }
 0x3b4   : > { %2124 = vst [vmem:[%s4082_s9] sm:$0xff] %v1966_v62  ;;  %v1968_v3 = vadd.f32 %v1967_v15, %v4079_v13 }
 0x3b5   : > { %v1969_v16 = vpop.f32.mrf.mxu0 }
 0x3b6   : > { %2125 = vst [vmem:[%s4082_s9 + $0x8] sm:$0xff] %v1968_v3  ;;  %v1970_v10 = vadd.f32 %v1969_v16, %v4076_v41 }
 0x3b7   : > { %v1971_v37 = vpop.f32.mrf.mxu0 }
 0x3b8   : > { %2126 = vst [vmem:[%s4082_s9 + $0x10] sm:$0xff] %v1970_v10  ;;  %v1972_v43 = vadd.f32 %v1971_v37, %v4079_v13 }
 0x3b9   : > { %v2105_v18 = vpop.f32.mrf.mxu1 }
 0x3ba   : > { %2127 = vst [vmem:[%s4082_s9 + $0x18] sm:$0xff] %v1972_v43  ;;  %v2106_v39 = vadd.f32 %v2105_v18, %v4076_v41 }
 0x3bb   : > { %v2107_v56 = vpop.f32.mrf.mxu1 }
 0x3bc   : > { %2180 = vst [vmem:[%s4082_s9 + $0x1c0] sm:$0xff] %v2106_v39  ;;  %v2108_v33 = vadd.f32 %v2107_v56, %v4079_v13 }
 0x3bd   : > { %v2109_v5 = vpop.f32.mrf.mxu1 }
 0x3be   : > { %2181 = vst [vmem:[%s4082_s9 + $0x1c8] sm:$0xff] %v2108_v33  ;;  %v2110_v44 = vadd.f32 %v2109_v5, %v4076_v41 }
 0x3bf   : > { %v2111_v45 = vpop.f32.mrf.mxu1 }
 0x3c0   : > { %2182 = vst [vmem:[%s4082_s9 + $0x1d0] sm:$0xff] %v2110_v44  ;;  %v2112_v22 = vadd.f32 %v2111_v45, %v4079_v13 }
 0x3c2   : > { %v1975_v25 = vpop.f32.mrf.mxu0  ;;  %2183 = vst [vmem:[%s4082_s9 + $0x1d8] sm:$0xff] %v2112_v22 }
 0x3c3   : > { %v1976_v50 = vadd.f32 %v1975_v25, %v4076_v41 }
 0x3c4   : > { %v1977_v31 = vpop.f32.mrf.mxu0 }
 0x3c5   : > { %2128 = vst [vmem:[%s4082_s9 + $0x20] sm:$0xff] %v1976_v50  ;;  %v1978_v38 = vadd.f32 %v1977_v31, %v4079_v13 }
 0x3c6   : > { %v1979_v30 = vpop.f32.mrf.mxu0 }
 0x3c7   : > { %2129 = vst [vmem:[%s4082_s9 + $0x28] sm:$0xff] %v1978_v38  ;;  %v1980_v59 = vadd.f32 %v1979_v30, %v4076_v41 }
 0x3c8   : > { %v1981_v20 = vpop.f32.mrf.mxu0 }
 0x3c9   : > { %2130 = vst [vmem:[%s4082_s9 + $0x30] sm:$0xff] %v1980_v59  ;;  %v1982_v35 = vadd.f32 %v1981_v20, %v4079_v13  ;;  %v2115_v49 = vpop.f32.mrf.mxu1 }
 0x3ca   : > { %v2116_v61 = vadd.f32 %v2115_v49, %v4076_v41 }
 0x3cb   : > { %2131 = vst [vmem:[%s4082_s9 + $0x38] sm:$0xff] %v1982_v35  ;;  %v2117_v57 = vpop.f32.mrf.mxu1 }
 0x3cc   : > { %2184 = vst [vmem:[%s4082_s9 + $0x1e0] sm:$0xff] %v2116_v61  ;;  %v2118_v14 = vadd.f32 %v2117_v57, %v4079_v13 }
 0x3cd   : > { %v2119_v2 = vpop.f32.mrf.mxu1 }
 0x3ce   : > { %2185 = vst [vmem:[%s4082_s9 + $0x1e8] sm:$0xff] %v2118_v14  ;;  %v2120_v52 = vadd.f32 %v2119_v2, %v4076_v41 }
 0x3cf   : > { %v2121_v40 = vpop.f32.mrf.mxu1 }
 0x3d0   : > { %2186 = vst [vmem:[%s4082_s9 + $0x1f0] sm:$0xff] %v2120_v52  ;;  %v2122_v32 = vadd.f32 %v2121_v40, %v4079_v13 }
 0x3d2   : > { %2187 = vst [vmem:[%s4082_s9 + $0x1f8] sm:$0xff] %v2122_v32 }
 0x3d3   : > { %2711 = shalt.err (!%p2708_p3)
}
 0x3d4   : > { %s2712_s23 = scalar_lea.hbm %s4213_s19, 8192  ;;  %s2716_s29 = scalar_lea.hbm %s4269_s7, 16384 }
 0x3d5   : > { %p2713_p4 = scmp.ne.s32.totalorder %s4213_s19, %s2712_s23  ;;  %p2717_p9 = scmp.lt.s32.totalorder %s4213_s19, %s4269_s7 }
 0x3d6   : > { %p2718_p10 = scmp.lt.s32.totalorder %s2716_s29, %s2712_s23 }
 0x3d7   : > { %p2714_p7 = pnand %p2713_p4, %p2842_p5 }
 0x3d8   : > { %p2719_p11 = por %p2718_p10, %p2717_p9 }
 0x3d9   : > { %p2715_p8 = pneg %p2714_p7 }
 0x3db   : > { %p2720_p12 = pnand %p2719_p11, %p2715_p8 }
 0x3dd   : > { %2723 = shalt.err (!%p2720_p12)
}
 0x3de   : > { %s2762_s16 = smov 256   ;;  %s2763_s17 = smov 16  }
 0x3df   : > { %2376 = dma.vmem_to_hbm [thread:$0]  (%p2842_p5), %s4215_s14, 8192, %s4213_s19, %s4222_s28, %s2762_s16, %s2762_s16, %s2763_s17  }
 0x3e0 PF: > { %p2382_p13 = scmp.ge.s32.totalorder %s2758_s27, 2  ;;  %s2218_s20 = sand.u32 1, %s2746_s24  }
 0x3e1   : > { %s2219_s15 = scalar_lea.sflag [#allocation3], %s2218_s20 }
 0x3e2   : > { %p2379_p0 = pnand %p2382_p13, %p2846_p6 }
 0x3e4   : > { %p2380_p1 = pneg %p2379_p0 }
 0x3e6   : > { %2741 = dma.done.wait (%p2380_p1), %s2219_s15, 8192  }
 0x3e7   : > { %2743 = vsyncadd (%p2380_p1), %s2219_s15, 4294959104  ;;  %p17_p2 = scmp.ge.s32.totalorder %s2829_s30, 4   ;;  %s4416_s24 = smov %s2750_s25 }
 0x3e8   : > { %s4417_s25 = smov %s2754_s26  ;;  %s4418_s26 = smov %s2840_s10 }
 0x3e9   : > { %s4419_s27 = smov %s2829_s30  ;;  %19 = sbr.rel (!%p17_p2) target bundleno = 3 (0x3), region = 83 }
 0x3ee   :  { %2224 = vsyncpa [#allocation3], 1 }
 0x3ef   :  { %2226 = vsyncpa [#allocation3 + $0x1], 1 }

</bundles_post_ra>
